<compile_context>
chip_gen: v7x
topology: tpu7x:2x2x1
jax: 0.10.0
libtpu: 0.0.40
codegen_flags: <defaults>
</compile_context>

<pallas_src>
import functools

import jax
import jax.numpy as jnp
from jax import lax
from jax.experimental import pallas as pl
from jax.experimental.pallas import tpu as pltpu


# ---------------------------------------------------------------------------
# helpers
# ---------------------------------------------------------------------------
def _layernorm(x, gamma, beta, eps=1e-5):
    mu = jnp.mean(x, axis=-1, keepdims=True)
    var = jnp.mean((x - mu) ** 2, axis=-1, keepdims=True)
    return (x - mu) * lax.rsqrt(var + eps) * gamma + beta


def _default_block_b(B, L, S):
    """Smallest batch tile that (a) divides B, (b) keeps row blocks a multiple
    of 8 (sublane constraint), and (c) leaves >= 2 grid steps when possible so
    input/output DMAs pipeline and v7x can split the parallel axis across its
    two TensorCores."""
    for bt in range(1, B + 1):
        if B % bt:
            continue
        rows_ok = (bt == B) or ((bt * L) % 8 == 0 and (bt * S) % 8 == 0)
        if not rows_ok:
            continue
        if B // bt >= 2 or bt == B:
            return bt
    return B


def _vmem_limit_bytes(Bt, L, S, D, Dq, Dv, d_ff, H, attn_bytes):
    """Rough per-step VMEM footprint -> explicit scoped-VMEM limit.
    Generous headroom, but stays under v7x's 64 MiB physical VMEM per core."""
    HS = H * S
    f32, bf16 = 4, 2
    # streaming blocks (double-buffered by the pipeline)
    blocks = 2 * (Bt * L * D * f32 + Bt * S * D * f32
                  + Bt * L * D * f32 + Bt * L * HS * attn_bytes)
    # single-buffered constants
    consts = ((D * Dq + D * Dq + D * Dv + Dv * D + D * d_ff + d_ff * D) * bf16
              + (2 * Dq + Dv + D + d_ff + 5 * D) * f32
              + (HS * Dq + HS * Dv) * f32 + (HS * H + H * HS) * bf16)
    # scratch + rough live intermediates
    live = (Bt * L * Dv * f32
            + (Bt * L * Dq + Bt * S * Dq + Bt * S * Dv) * f32
            + 3 * L * HS * f32 + 2 * HS * max(Dq, Dv) * f32
            + Bt * L * d_ff * f32 + 4 * Bt * L * D * f32)
    est = blocks + consts + live
    return int(min(max(2 * est, 32 * 2 ** 20), 56 * 2 ** 20))


# ---------------------------------------------------------------------------
# Pallas kernel: one BCAB branch, Bt batch elements per grid step.
# ---------------------------------------------------------------------------
def bcab_branch_kernel(
    q_ref, kv_ref,
    wqT_ref, bq_ref, wkT_ref, bk_ref, wvT_ref, bv_ref, woT_ref, bo_ref,
    w1T_ref, b1_ref, w2T_ref, b2_ref,
    g1_ref, be1_ref, g2_ref, be2_ref,
    maskk_ref, maskv_ref, segsum_ref, segbcast_ref,
    out_ref, attn_ref,
    o_scratch,
    *, bt, l_len, s_len, n_heads,
):
    f32, bf16 = jnp.float32, jnp.bfloat16
    H = n_heads

    x = q_ref[...]                       # (bt*L, D) f32  query-side residual
    kv = kv_ref[...]                     # (bt*S, D) f32  key/value source
    x_bf = x.astype(bf16)                # hoisted casts (reused below)
    kv_bf = kv.astype(bf16)

    # --- Q/K/V projections: one big matmul each over the whole block.
    #     Weights pre-transposed bf16; softmax scale folded into Wq/bq. ---
    q_all = jnp.dot(x_bf, wqT_ref[...], preferred_element_type=f32) + bq_ref[...]
    k_all = jnp.dot(kv_bf, wkT_ref[...], preferred_element_type=f32) + bk_ref[...]
    v_all = jnp.dot(kv_bf, wvT_ref[...], preferred_element_type=f32) + bv_ref[...]

    # Precomputed head-structure constants (loaded once per step, constant
    # index_map + single buffer => one-time DMA overall).
    mask_k = maskk_ref[...]              # (H*S, Dq) f32 block-diag mask
    mask_v = maskv_ref[...]              # (H*S, Dv) f32 block-diag mask
    segsum = segsum_ref[...]             # (H*S, H)  bf16 segment-sum matrix
    segbcast = segbcast_ref[...]         # (H, H*S)  bf16 broadcast-back matrix

    # TODO(synk): for bt > ~4 convert this static loop to lax.fori_loop over
    # VMEM scratch (pl.ds slices) to bound vreg live ranges and code size.
    for b in range(bt):
        qb = q_all[b * l_len:(b + 1) * l_len, :]       # (L, Dq) f32
        kb = k_all[b * s_len:(b + 1) * s_len, :]       # (S, Dq) f32
        vb = v_all[b * s_len:(b + 1) * s_len, :]       # (S, Dv) f32

        # Head block-diagonal K (H*S, Dq): one matmul covers all heads and
        # keeps scores lane-dense as (L, H*S).  Contracting the LAST dims via
        # dot_general avoids an explicit transpose of kb.
        # TODO(synk): gate this on H*d_k <= native MXU K (128 v5e / 256 v6e+)
        # and fall back to a per-head batched dot_general above that.
        kbd = (mask_k * jnp.concatenate([kb] * H, axis=0)).astype(bf16)
        dots = lax.dot_general(qb.astype(bf16), kbd,
                               (((1,), (1,)), ((), ())),
                               preferred_element_type=f32)        # (L, H*S)

        # Per-S-segment softmax.  Subtracting the global per-row max is exact
        # for the per-segment softmax (constant within every segment).
        # TODO(synk): switch to per-segment maxima if heads can have wildly
        # different score scales (whole-segment exp underflow).
        e = jnp.exp(dots - jnp.max(dots, axis=-1, keepdims=True))  # (L, H*S) f32
        # Denominator: thin (HS,H) segment-sum matmul, reciprocal on the small
        # (L,H) tile (EUP), then (H,HS) broadcast-back — O(L*HS*H) total.
        seg = jnp.dot(e.astype(bf16), segsum, preferred_element_type=f32)   # (L, H)
        inv = pl.reciprocal(jnp.maximum(seg, 1e-30), approx=True)           # (L, H)
        inv_full = jnp.dot(inv.astype(bf16), segbcast,
                           preferred_element_type=f32)                      # (L, H*S)
        attn_b = e * inv_full
        # single lane-dense store per batch element (no per-head stores)
        attn_ref[b * l_len:(b + 1) * l_len, :] = attn_b.astype(attn_ref.dtype)

        # Head block-diagonal V: attn @ Vbd yields heads already concatenated
        # into (L, H*dv); written straight to VMEM scratch (no list + concat).
        vbd = (mask_v * jnp.concatenate([vb] * H, axis=0)).astype(bf16)
        o_scratch[b * l_len:(b + 1) * l_len, :] = jnp.dot(
            attn_b.astype(bf16), vbd, preferred_element_type=f32)

    attn_out = (jnp.dot(o_scratch[...].astype(bf16), woT_ref[...],
                        preferred_element_type=f32) + bo_ref[...])

    # --- residual + LayerNorm 1 (f32) ---
    x1 = _layernorm(x + attn_out, g1_ref[...], be1_ref[...])

    # --- FFN: relu(x1 @ W1^T + b1) @ W2^T + b2 (bf16 MXU operands, f32 acc) ---
    y = jnp.dot(x1.astype(bf16), w1T_ref[...], preferred_element_type=f32) + b1_ref[...]
    y = jnp.maximum(y, 0.0)
    y = jnp.dot(y.astype(bf16), w2T_ref[...], preferred_element_type=f32) + b2_ref[...]

    # --- residual + LayerNorm 2 (f32) ---
    out_ref[...] = _layernorm(x1 + y, g2_ref[...], be2_ref[...]).astype(out_ref.dtype)


# ---------------------------------------------------------------------------
# Wrapper: one branch (called twice by BCAB forward)
# ---------------------------------------------------------------------------
def bcab_branch(q, kv, p, *, n_heads, block_b=None, attn_dtype=jnp.float32):
    B, L, D = q.shape
    S = kv.shape[1]
    H = n_heads
    Dq = p["wq"].shape[0]
    Dv = p["wv"].shape[0]
    dk, dv = Dq // H, Dv // H
    scale = float(dk) ** -0.5
    HS = H * S
    d_ff = p["w1"].shape[0]

    Bt = _default_block_b(B, L, S) if block_b is None else block_b
    assert B % Bt == 0, "block_b must divide B"
    assert Bt == B or ((Bt * L) % 8 == 0 and (Bt * S) % 8 == 0)

    # flatten rows so projections/FFN see a (Bt*rows, D) M-dim per grid step
    qflat = q.reshape(B * L, D).astype(jnp.float32)
    kvflat = kv.reshape(B * S, D).astype(jnp.float32)

    # wrapper-side weight prep: pre-transpose (no in-kernel .T), fold the
    # softmax scale into Wq/bq, cast MXU operands to bf16 once.
    bf16, f32 = jnp.bfloat16, jnp.float32
    wqT = (p["wq"] * scale).T.astype(bf16); bq = (p["bq"] * scale).astype(f32)
    wkT = p["wk"].T.astype(bf16);           bk = p["bk"].astype(f32)
    wvT = p["wv"].T.astype(bf16);           bv = p["bv"].astype(f32)
    woT = p["wo"].T.astype(bf16);           bo = p["bo"].astype(f32)
    w1T = p["w1"].T.astype(bf16);           b1 = p["b1"].astype(f32)
    w2T = p["w2"].T.astype(bf16);           b2 = p["b2"].astype(f32)
    g1, be1 = p["g1"].astype(f32), p["be1"].astype(f32)
    g2, be2 = p["g2"].astype(f32), p["be2"].astype(f32)

    # Static head-structure constants (built once on host, single-buffered).
    seg_row = jnp.arange(HS, dtype=jnp.int32) // S
    mask_k = (seg_row[:, None] ==
              (jnp.arange(Dq, dtype=jnp.int32) // dk)[None, :]).astype(f32)   # (HS, Dq)
    mask_v = (seg_row[:, None] ==
              (jnp.arange(Dv, dtype=jnp.int32) // dv)[None, :]).astype(f32)   # (HS, Dv)
    heads_i = jnp.arange(H, dtype=jnp.int32)
    segsum = (seg_row[:, None] == heads_i[None, :]).astype(bf16)              # (HS, H)
    segbcast = (heads_i[:, None] == seg_row[None, :]).astype(bf16)            # (H, HS)

    consts = [wqT, bq, wkT, bk, wvT, bv, woT, bo, w1T, b1, w2T, b2,
              g1, be1, g2, be2, mask_k, mask_v, segsum, segbcast]

    kernel = functools.partial(bcab_branch_kernel,
                               bt=Bt, l_len=L, s_len=S, n_heads=H)
    vmem_limit = _vmem_limit_bytes(Bt, L, S, D, Dq, Dv, d_ff, H,
                                   jnp.dtype(attn_dtype).itemsize)

    def _const_spec(a, single_buffer):
        nd = a.ndim
        idx = lambda i, _nd=nd: (0,) * _nd
        if single_buffer:
            try:
                # constant index_map => double-buffering is wasted VMEM
                return pl.BlockSpec(a.shape, idx, pipeline_mode=pl.Buffered(1))
            except (TypeError, AttributeError):
                pass
        return pl.BlockSpec(a.shape, idx)

    def _run(single_buffer_consts):
        in_specs = [
            pl.BlockSpec((Bt * L, D), lambda i: (i, 0)),
            pl.BlockSpec((Bt * S, D), lambda i: (i, 0)),
        ] + [_const_spec(a, single_buffer_consts) for a in consts]
        out_specs = [
            pl.BlockSpec((Bt * L, D), lambda i: (i, 0)),
            pl.BlockSpec((Bt * L, HS), lambda i: (i, 0)),   # lane-dense attention
        ]
        out_shape = (
            jax.ShapeDtypeStruct((B * L, D), jnp.float32),
            jax.ShapeDtypeStruct((B * L, HS), attn_dtype),
        )
        return pl.pallas_call(
            kernel,
            out_shape=out_shape,
            grid_spec=pltpu.PrefetchScalarGridSpec(
                num_scalar_prefetch=0,
                grid=(B // Bt,),
                in_specs=in_specs,
                out_specs=out_specs,
                scratch_shapes=[pltpu.VMEM((Bt * L, Dv), jnp.float32)],
            ),
            compiler_params=pltpu.CompilerParams(
                dimension_semantics=("parallel",),
                vmem_limit_bytes=vmem_limit,
            ),
        )(qflat, kvflat, *consts)

    try:
        out2d, attn2d = _run(True)
    except Exception:
        # Fallback if pipeline_mode=pl.Buffered(1) is unsupported: identical
        # math, just double-buffered constants.
        out2d, attn2d = _run(False)

    out = out2d.reshape(B, L, D)
    attn = attn2d.astype(jnp.float32).reshape(B, L, H, S).transpose(0, 2, 1, 3)
    return out, attn


def bcab_forward(basis, series, params, *, n_heads):
    # TODO(synk): on v7x the two branches could be fused into one pallas_call
    # (padded to max(L, S)) so both TensorCores stay busy even when B < 2;
    # with the batch-tiled "parallel" grid (>= 2 steps) both cores are already
    # used for B >= 2, so the branches stay separate here.
    basis_out, basis_attn = bcab_branch(basis, series, params["basis"], n_heads=n_heads)
    series_out, series_attn = bcab_branch(series, basis, params["ts"], n_heads=n_heads)
    return basis_out, series_out, basis_attn, series_attn


# ---------------------------------------------------------------------------
# Deterministic parameter construction (weight_norm folded to effective W)
# ---------------------------------------------------------------------------
def _wn_linear(key, out_f, in_f):
    k1, k2, k3 = jax.random.split(key, 3)
    v = jax.random.normal(k1, (out_f, in_f), jnp.float32) * 0.2
    g = jax.random.uniform(k2, (out_f,), jnp.float32, minval=0.5, maxval=1.5)
    w = g[:, None] * v / jnp.linalg.norm(v, axis=1, keepdims=True)
    b = jax.random.normal(k3, (out_f,), jnp.float32) * 0.05
    return w, b.reshape(1, out_f)


def make_branch_params(key, d_model, n_heads, d_ff):
    d_keys = d_model // n_heads
    ks = jax.random.split(key, 6)
    wq, bq = _wn_linear(ks[0], d_keys * n_heads, d_model)
    wk, bk = _wn_linear(ks[1], d_keys * n_heads, d_model)
    wv, bv = _wn_linear(ks[2], d_keys * n_heads, d_model)
    wo, bo = _wn_linear(ks[3], d_model, d_keys * n_heads)
    w1, b1 = _wn_linear(ks[4], d_ff, d_model)
    w2, b2 = _wn_linear(ks[5], d_model, d_ff)
    ones = jnp.ones((1, d_model), jnp.float32)
    zeros = jnp.zeros((1, d_model), jnp.float32)
    return dict(wq=wq, bq=bq, wk=wk, bk=bk, wv=wv, bv=bv, wo=wo, bo=bo,
                w1=w1, b1=b1, w2=w2, b2=b2,
                g1=ones, be1=zeros, g2=ones, be2=zeros)


# ---------------------------------------------------------------------------
# Pure-JAX reference (f32, same math) for correctness check
# ---------------------------------------------------------------------------
def _ref_branch(q, kv, p, n_heads, scale):
    B, L, D = q.shape
    S = kv.shape[1]
    H = n_heads
    qp = q @ p["wq"].T + p["bq"]
    kp = kv @ p["wk"].T + p["bk"]
    vp = kv @ p["wv"].T + p["bv"]
    dk = qp.shape[-1] // H
    qh = qp.reshape(B, L, H, dk).transpose(0, 2, 1, 3)
    kh = kp.reshape(B, S, H, dk).transpose(0, 2, 1, 3)
    vh = vp.reshape(B, S, H, dk).transpose(0, 2, 1, 3)
    dots = jnp.einsum("bhld,bhsd->bhls", qh, kh) * scale
    attn = jax.nn.softmax(dots, axis=-1)
    o = jnp.einsum("bhls,bhsd->bhld", attn, vh).transpose(0, 2, 1, 3).reshape(B, L, -1)
    attn_out = o @ p["wo"].T + p["bo"]

    def ln(x, g, b):
        mu = x.mean(-1, keepdims=True)
        var = ((x - mu) ** 2).mean(-1, keepdims=True)
        return (x - mu) / jnp.sqrt(var + 1e-5) * g + b

    x1 = ln(q + attn_out, p["g1"], p["be1"])
    y = jnp.maximum(x1 @ p["w1"].T + p["b1"], 0.0) @ p["w2"].T + p["b2"]
    x2 = ln(x1 + y, p["g2"], p["be2"])
    return x2, attn


if __name__ == "__main__":
    # Small shapes consistent with BCAB's forward (3-D branch).
    B, L, S = 2, 8, 16        # batch, basis length, series length
    d_model, heads = 32, 8
    d_ff = 4 * d_model
    d_keys = d_model // heads

    key = jax.random.PRNGKey(0)
    k_basis, k_series, k_pb, k_pt = jax.random.split(key, 4)
    basis = jax.random.normal(k_basis, (B, L, d_model), jnp.float32)
    series = jax.random.normal(k_series, (B, S, d_model), jnp.float32)

    params = {
        "basis": make_branch_params(k_pb, d_model, heads, d_ff),
        "ts": make_branch_params(k_pt, d_model, heads, d_ff),
    }

    basis_out, series_out, basis_attn, series_attn = jax.block_until_ready(
        bcab_forward(basis, series, params, n_heads=heads))

    # sanity check against pure-JAX f32 reference (bf16 MXU + approx recip drift
    # stays well inside this tolerance)
    scale = d_keys ** -0.5
    ref_b, ref_ba = _ref_branch(basis, series, params["basis"], heads, scale)
    ref_s, ref_sa = _ref_branch(series, basis, params["ts"], heads, scale)
    assert basis_out.shape == (B, L, d_model)
    assert series_out.shape == (B, S, d_model)
    assert basis_attn.shape == (B, heads, L, S)
    assert series_attn.shape == (B, heads, S, L)
    assert jnp.allclose(basis_out, ref_b, atol=5e-2, rtol=5e-2)
    assert jnp.allclose(series_out, ref_s, atol=5e-2, rtol=5e-2)
    assert jnp.allclose(basis_attn, ref_ba, atol=5e-2, rtol=5e-2)
    assert jnp.allclose(series_attn, ref_sa, atol=5e-2, rtol=5e-2)

    print("KERNEL_OK")
</pallas_src>

<mosaic_0001>
module attributes {stable_mosaic.version = 11 : i64} {
  func.func @bcab_branch_kernel(%arg0: i32, %arg1: memref<8x32xf32, #tpu.memory_space<vmem>>, %arg2: memref<16x32xf32, #tpu.memory_space<vmem>>, %arg3: memref<32x32xbf16, #tpu.memory_space<vmem>>, %arg4: memref<1x32xf32, #tpu.memory_space<vmem>>, %arg5: memref<32x32xbf16, #tpu.memory_space<vmem>>, %arg6: memref<1x32xf32, #tpu.memory_space<vmem>>, %arg7: memref<32x32xbf16, #tpu.memory_space<vmem>>, %arg8: memref<1x32xf32, #tpu.memory_space<vmem>>, %arg9: memref<32x32xbf16, #tpu.memory_space<vmem>>, %arg10: memref<1x32xf32, #tpu.memory_space<vmem>>, %arg11: memref<32x128xbf16, #tpu.memory_space<vmem>>, %arg12: memref<1x128xf32, #tpu.memory_space<vmem>>, %arg13: memref<128x32xbf16, #tpu.memory_space<vmem>>, %arg14: memref<1x32xf32, #tpu.memory_space<vmem>>, %arg15: memref<1x32xf32, #tpu.memory_space<vmem>>, %arg16: memref<1x32xf32, #tpu.memory_space<vmem>>, %arg17: memref<1x32xf32, #tpu.memory_space<vmem>>, %arg18: memref<1x32xf32, #tpu.memory_space<vmem>>, %arg19: memref<128x32xf32, #tpu.memory_space<vmem>>, %arg20: memref<128x32xf32, #tpu.memory_space<vmem>>, %arg21: memref<128x8xbf16, #tpu.memory_space<vmem>>, %arg22: memref<8x128xbf16, #tpu.memory_space<vmem>>, %arg23: memref<8x32xf32, #tpu.memory_space<vmem>>, %arg24: memref<8x128xf32, #tpu.memory_space<vmem>>, %arg25: memref<8x32xf32, #tpu.memory_space<vmem>>) attributes {dimension_semantics = [#tpu.dimension_semantics<parallel>], iteration_bounds = array<i64: 2>, scalar_prefetch = 0 : i64, scratch_operands = 1 : i64, tpu.core_type = #tpu.core_type<tc>, window_params = [{transform_indices = @transform_0, window_bounds = array<i64: 8, 32>}, {transform_indices = @transform_1, window_bounds = array<i64: 16, 32>}, {pipeline_mode = #tpu.pipeline_mode<synchronous>, transform_indices = @transform_2, window_bounds = array<i64: 32, 32>}, {pipeline_mode = #tpu.pipeline_mode<synchronous>, transform_indices = @transform_3, window_bounds = array<i64: 1, 32>}, {pipeline_mode = #tpu.pipeline_mode<synchronous>, transform_indices = @transform_4, window_bounds = array<i64: 32, 32>}, {pipeline_mode = #tpu.pipeline_mode<synchronous>, transform_indices = @transform_5, window_bounds = array<i64: 1, 32>}, {pipeline_mode = #tpu.pipeline_mode<synchronous>, transform_indices = @transform_6, window_bounds = array<i64: 32, 32>}, {pipeline_mode = #tpu.pipeline_mode<synchronous>, transform_indices = @transform_7, window_bounds = array<i64: 1, 32>}, {pipeline_mode = #tpu.pipeline_mode<synchronous>, transform_indices = @transform_8, window_bounds = array<i64: 32, 32>}, {pipeline_mode = #tpu.pipeline_mode<synchronous>, transform_indices = @transform_9, window_bounds = array<i64: 1, 32>}, {pipeline_mode = #tpu.pipeline_mode<synchronous>, transform_indices = @transform_10, window_bounds = array<i64: 32, 128>}, {pipeline_mode = #tpu.pipeline_mode<synchronous>, transform_indices = @transform_11, window_bounds = array<i64: 1, 128>}, {pipeline_mode = #tpu.pipeline_mode<synchronous>, transform_indices = @transform_12, window_bounds = array<i64: 128, 32>}, {pipeline_mode = #tpu.pipeline_mode<synchronous>, transform_indices = @transform_13, window_bounds = array<i64: 1, 32>}, {pipeline_mode = #tpu.pipeline_mode<synchronous>, transform_indices = @transform_14, window_bounds = array<i64: 1, 32>}, {pipeline_mode = #tpu.pipeline_mode<synchronous>, transform_indices = @transform_15, window_bounds = array<i64: 1, 32>}, {pipeline_mode = #tpu.pipeline_mode<synchronous>, transform_indices = @transform_16, window_bounds = array<i64: 1, 32>}, {pipeline_mode = #tpu.pipeline_mode<synchronous>, transform_indices = @transform_17, window_bounds = array<i64: 1, 32>}, {pipeline_mode = #tpu.pipeline_mode<synchronous>, transform_indices = @transform_18, window_bounds = array<i64: 128, 32>}, {pipeline_mode = #tpu.pipeline_mode<synchronous>, transform_indices = @transform_19, window_bounds = array<i64: 128, 32>}, {pipeline_mode = #tpu.pipeline_mode<synchronous>, transform_indices = @transform_20, window_bounds = array<i64: 128, 8>}, {pipeline_mode = #tpu.pipeline_mode<synchronous>, transform_indices = @transform_21, window_bounds = array<i64: 8, 128>}, {transform_indices = @transform_22, window_bounds = array<i64: 8, 32>}, {transform_indices = @transform_23, window_bounds = array<i64: 8, 128>}]} {
    %c0 = arith.constant 0 : index
    %c0_0 = arith.constant 0 : index
    %0 = vector.load %arg1[%c0, %c0_0] : memref<8x32xf32, #tpu.memory_space<vmem>>, vector<8x32xf32>
    %c0_1 = arith.constant 0 : index
    %c0_2 = arith.constant 0 : index
    %1 = vector.load %arg2[%c0_1, %c0_2] : memref<16x32xf32, #tpu.memory_space<vmem>>, vector<16x32xf32>
    %2 = arith.truncf %0 : vector<8x32xf32> to vector<8x32xbf16>
    %3 = arith.truncf %1 : vector<16x32xf32> to vector<16x32xbf16>
    %c0_3 = arith.constant 0 : index
    %c0_4 = arith.constant 0 : index
    %4 = vector.load %arg3[%c0_3, %c0_4] : memref<32x32xbf16, #tpu.memory_space<vmem>>, vector<32x32xbf16>
    %cst = arith.constant dense<0.000000e+00> : vector<8x32xf32>
    %5 = tpu.matmul %2, %4, %cst {dimension_numbers = #tpu.dot_dimension_numbers<[1], [0], [0], [1], [0, 0, 1, 1], [], []>} : vector<8x32xbf16>, vector<32x32xbf16>, vector<8x32xf32> -> vector<8x32xf32>
    %c0_5 = arith.constant 0 : index
    %c0_6 = arith.constant 0 : index
    %6 = vector.load %arg4[%c0_5, %c0_6] : memref<1x32xf32, #tpu.memory_space<vmem>>, vector<1x32xf32>
    %7 = vector.broadcast %6 : vector<1x32xf32> to vector<8x32xf32>
    %8 = arith.addf %5, %7 : vector<8x32xf32>
    %c0_7 = arith.constant 0 : index
    %c0_8 = arith.constant 0 : index
    %9 = vector.load %arg5[%c0_7, %c0_8] : memref<32x32xbf16, #tpu.memory_space<vmem>>, vector<32x32xbf16>
    %cst_9 = arith.constant dense<0.000000e+00> : vector<16x32xf32>
    %10 = tpu.matmul %3, %9, %cst_9 {dimension_numbers = #tpu.dot_dimension_numbers<[1], [0], [0], [1], [0, 0, 1, 1], [], []>} : vector<16x32xbf16>, vector<32x32xbf16>, vector<16x32xf32> -> vector<16x32xf32>
    %c0_10 = arith.constant 0 : index
    %c0_11 = arith.constant 0 : index
    %11 = vector.load %arg6[%c0_10, %c0_11] : memref<1x32xf32, #tpu.memory_space<vmem>>, vector<1x32xf32>
    %12 = vector.broadcast %11 : vector<1x32xf32> to vector<16x32xf32>
    %13 = arith.addf %10, %12 : vector<16x32xf32>
    %c0_12 = arith.constant 0 : index
    %c0_13 = arith.constant 0 : index
    %14 = vector.load %arg7[%c0_12, %c0_13] : memref<32x32xbf16, #tpu.memory_space<vmem>>, vector<32x32xbf16>
    %cst_14 = arith.constant dense<0.000000e+00> : vector<16x32xf32>
    %15 = tpu.matmul %3, %14, %cst_14 {dimension_numbers = #tpu.dot_dimension_numbers<[1], [0], [0], [1], [0, 0, 1, 1], [], []>} : vector<16x32xbf16>, vector<32x32xbf16>, vector<16x32xf32> -> vector<16x32xf32>
    %c0_15 = arith.constant 0 : index
    %c0_16 = arith.constant 0 : index
    %16 = vector.load %arg8[%c0_15, %c0_16] : memref<1x32xf32, #tpu.memory_space<vmem>>, vector<1x32xf32>
    %17 = vector.broadcast %16 : vector<1x32xf32> to vector<16x32xf32>
    %18 = arith.addf %15, %17 : vector<16x32xf32>
    %c0_17 = arith.constant 0 : index
    %c0_18 = arith.constant 0 : index
    %19 = vector.load %arg19[%c0_17, %c0_18] : memref<128x32xf32, #tpu.memory_space<vmem>>, vector<128x32xf32>
    %c0_19 = arith.constant 0 : index
    %c0_20 = arith.constant 0 : index
    %20 = vector.load %arg20[%c0_19, %c0_20] : memref<128x32xf32, #tpu.memory_space<vmem>>, vector<128x32xf32>
    %c0_21 = arith.constant 0 : index
    %c0_22 = arith.constant 0 : index
    %21 = vector.load %arg21[%c0_21, %c0_22] : memref<128x8xbf16, #tpu.memory_space<vmem>>, vector<128x8xbf16>
    %c0_23 = arith.constant 0 : index
    %c0_24 = arith.constant 0 : index
    %22 = vector.load %arg22[%c0_23, %c0_24] : memref<8x128xbf16, #tpu.memory_space<vmem>>, vector<8x128xbf16>
    %23 = tpu.concatenate %13, %13, %13, %13, %13, %13, %13, %13 in 0 : vector<16x32xf32>, vector<16x32xf32>, vector<16x32xf32>, vector<16x32xf32>, vector<16x32xf32>, vector<16x32xf32>, vector<16x32xf32>, vector<16x32xf32> -> vector<128x32xf32>
    %24 = arith.mulf %19, %23 : vector<128x32xf32>
    %25 = arith.truncf %24 : vector<128x32xf32> to vector<128x32xbf16>
    %26 = arith.truncf %8 : vector<8x32xf32> to vector<8x32xbf16>
    %cst_25 = arith.constant dense<0.000000e+00> : vector<8x128xf32>
    %27 = tpu.matmul %26, %25, %cst_25 {dimension_numbers = #tpu.dot_dimension_numbers<[1], [1], [0], [0], [0, 0, 1, 0], [], []>} : vector<8x32xbf16>, vector<128x32xbf16>, vector<8x128xf32> -> vector<8x128xf32>
    %cst_26 = arith.constant dense<0xFF800000> : vector<8xf32>
    %28 = vector.multi_reduction <maximumf>, %27, %cst_26 [1] : vector<8x128xf32> to vector<8xf32>
    %29 = vector.shape_cast %28 : vector<8xf32> to vector<8x1xf32>
    %30 = vector.broadcast %29 : vector<8x1xf32> to vector<8x128xf32>
    %31 = arith.subf %27, %30 : vector<8x128xf32>
    %32 = math.exp %31 : vector<8x128xf32>
    %33 = arith.truncf %32 : vector<8x128xf32> to vector<8x128xbf16>
    %cst_27 = arith.constant dense<0.000000e+00> : vector<8x8xf32>
    %34 = tpu.matmul %33, %21, %cst_27 {dimension_numbers = #tpu.dot_dimension_numbers<[1], [0], [0], [1], [0, 0, 1, 1], [], []>} : vector<8x128xbf16>, vector<128x8xbf16>, vector<8x8xf32> -> vector<8x8xf32>
    %cst_28 = arith.constant 1.000000e-30 : f32
    %35 = vector.broadcast %cst_28 : f32 to vector<8x8xf32>
    %36 = arith.maximumf %34, %35 : vector<8x8xf32>
    %37 = tpu.reciprocal %36 {approx = true} : vector<8x8xf32> -> vector<8x8xf32>
    %38 = arith.truncf %37 : vector<8x8xf32> to vector<8x8xbf16>
    %cst_29 = arith.constant dense<0.000000e+00> : vector<8x128xf32>
    %39 = tpu.matmul %38, %22, %cst_29 {dimension_numbers = #tpu.dot_dimension_numbers<[1], [0], [0], [1], [0, 0, 1, 1], [], []>} : vector<8x8xbf16>, vector<8x128xbf16>, vector<8x128xf32> -> vector<8x128xf32>
    %40 = arith.mulf %32, %39 : vector<8x128xf32>
    %c0_30 = arith.constant 0 : index
    %c0_31 = arith.constant 0 : index
    %41 = vector.load %arg24[%c0_30, %c0_31] : memref<8x128xf32, #tpu.memory_space<vmem>>, vector<8x128xf32>
    tpu.vector_store %arg24[%c0_30, %c0_31], %40 {strides = array<i32>} : memref<8x128xf32, #tpu.memory_space<vmem>>, vector<8x128xf32>,
    %42 = tpu.concatenate %18, %18, %18, %18, %18, %18, %18, %18 in 0 : vector<16x32xf32>, vector<16x32xf32>, vector<16x32xf32>, vector<16x32xf32>, vector<16x32xf32>, vector<16x32xf32>, vector<16x32xf32>, vector<16x32xf32> -> vector<128x32xf32>
    %43 = arith.mulf %20, %42 : vector<128x32xf32>
    %44 = arith.truncf %43 : vector<128x32xf32> to vector<128x32xbf16>
    %45 = arith.truncf %40 : vector<8x128xf32> to vector<8x128xbf16>
    %cst_32 = arith.constant dense<0.000000e+00> : vector<8x32xf32>
    %46 = tpu.matmul %45, %44, %cst_32 {dimension_numbers = #tpu.dot_dimension_numbers<[1], [0], [0], [1], [0, 0, 1, 1], [], []>} : vector<8x128xbf16>, vector<128x32xbf16>, vector<8x32xf32> -> vector<8x32xf32>
    %c0_33 = arith.constant 0 : index
    %c0_34 = arith.constant 0 : index
    %47 = vector.load %arg25[%c0_33, %c0_34] : memref<8x32xf32, #tpu.memory_space<vmem>>, vector<8x32xf32>
    tpu.vector_store %arg25[%c0_33, %c0_34], %46 {strides = array<i32>} : memref<8x32xf32, #tpu.memory_space<vmem>>, vector<8x32xf32>,
    %c0_35 = arith.constant 0 : index
    %c0_36 = arith.constant 0 : index
    %48 = vector.load %arg25[%c0_35, %c0_36] : memref<8x32xf32, #tpu.memory_space<vmem>>, vector<8x32xf32>
    %49 = arith.truncf %48 : vector<8x32xf32> to vector<8x32xbf16>
    %c0_37 = arith.constant 0 : index
    %c0_38 = arith.constant 0 : index
    %50 = vector.load %arg9[%c0_37, %c0_38] : memref<32x32xbf16, #tpu.memory_space<vmem>>, vector<32x32xbf16>
    %cst_39 = arith.constant dense<0.000000e+00> : vector<8x32xf32>
    %51 = tpu.matmul %49, %50, %cst_39 {dimension_numbers = #tpu.dot_dimension_numbers<[1], [0], [0], [1], [0, 0, 1, 1], [], []>} : vector<8x32xbf16>, vector<32x32xbf16>, vector<8x32xf32> -> vector<8x32xf32>
    %c0_40 = arith.constant 0 : index
    %c0_41 = arith.constant 0 : index
    %52 = vector.load %arg10[%c0_40, %c0_41] : memref<1x32xf32, #tpu.memory_space<vmem>>, vector<1x32xf32>
    %53 = vector.broadcast %52 : vector<1x32xf32> to vector<8x32xf32>
    %54 = arith.addf %51, %53 : vector<8x32xf32>
    %55 = arith.addf %0, %54 : vector<8x32xf32>
    %c0_42 = arith.constant 0 : index
    %c0_43 = arith.constant 0 : index
    %56 = vector.load %arg15[%c0_42, %c0_43] : memref<1x32xf32, #tpu.memory_space<vmem>>, vector<1x32xf32>
    %c0_44 = arith.constant 0 : index
    %c0_45 = arith.constant 0 : index
    %57 = vector.load %arg16[%c0_44, %c0_45] : memref<1x32xf32, #tpu.memory_space<vmem>>, vector<1x32xf32>
    %cst_46 = arith.constant dense<0.000000e+00> : vector<8xf32>
    %58 = vector.multi_reduction <add>, %55, %cst_46 [1] : vector<8x32xf32> to vector<8xf32>
    %59 = vector.shape_cast %58 : vector<8xf32> to vector<8x1xf32>
    %cst_47 = arith.constant 3.200000e+01 : f32
    %60 = vector.broadcast %cst_47 : f32 to vector<8x1xf32>
    %61 = arith.divf %59, %60 : vector<8x1xf32>
    %62 = vector.broadcast %61 : vector<8x1xf32> to vector<8x32xf32>
    %63 = arith.subf %55, %62 : vector<8x32xf32>
    %64 = arith.mulf %63, %63 : vector<8x32xf32>
    %cst_48 = arith.constant dense<0.000000e+00> : vector<8xf32>
    %65 = vector.multi_reduction <add>, %64, %cst_48 [1] : vector<8x32xf32> to vector<8xf32>
    %66 = vector.shape_cast %65 : vector<8xf32> to vector<8x1xf32>
    %cst_49 = arith.constant 3.200000e+01 : f32
    %67 = vector.broadcast %cst_49 : f32 to vector<8x1xf32>
    %68 = arith.divf %66, %67 : vector<8x1xf32>
    %69 = vector.broadcast %61 : vector<8x1xf32> to vector<8x32xf32>
    %70 = arith.subf %55, %69 : vector<8x32xf32>
    %cst_50 = arith.constant 9.99999974E-6 : f32
    %71 = vector.broadcast %cst_50 : f32 to vector<8x1xf32>
    %72 = arith.addf %68, %71 : vector<8x1xf32>
    %73 = math.rsqrt %72 : vector<8x1xf32>
    %74 = vector.broadcast %73 : vector<8x1xf32> to vector<8x32xf32>
    %75 = arith.mulf %70, %74 : vector<8x32xf32>
    %76 = vector.broadcast %56 : vector<1x32xf32> to vector<8x32xf32>
    %77 = arith.mulf %75, %76 : vector<8x32xf32>
    %78 = vector.broadcast %57 : vector<1x32xf32> to vector<8x32xf32>
    %79 = arith.addf %77, %78 : vector<8x32xf32>
    %80 = arith.truncf %79 : vector<8x32xf32> to vector<8x32xbf16>
    %c0_51 = arith.constant 0 : index
    %c0_52 = arith.constant 0 : index
    %81 = vector.load %arg11[%c0_51, %c0_52] : memref<32x128xbf16, #tpu.memory_space<vmem>>, vector<32x128xbf16>
    %cst_53 = arith.constant dense<0.000000e+00> : vector<8x128xf32>
    %82 = tpu.matmul %80, %81, %cst_53 {dimension_numbers = #tpu.dot_dimension_numbers<[1], [0], [0], [1], [0, 0, 1, 1], [], []>} : vector<8x32xbf16>, vector<32x128xbf16>, vector<8x128xf32> -> vector<8x128xf32>
    %c0_54 = arith.constant 0 : index
    %c0_55 = arith.constant 0 : index
    %83 = vector.load %arg12[%c0_54, %c0_55] : memref<1x128xf32, #tpu.memory_space<vmem>>, vector<1x128xf32>
    %84 = vector.broadcast %83 : vector<1x128xf32> to vector<8x128xf32>
    %85 = arith.addf %82, %84 : vector<8x128xf32>
    %cst_56 = arith.constant 0.000000e+00 : f32
    %86 = vector.broadcast %cst_56 : f32 to vector<8x128xf32>
    %87 = arith.maximumf %85, %86 : vector<8x128xf32>
    %88 = arith.truncf %87 : vector<8x128xf32> to vector<8x128xbf16>
    %c0_57 = arith.constant 0 : index
    %c0_58 = arith.constant 0 : index
    %89 = vector.load %arg13[%c0_57, %c0_58] : memref<128x32xbf16, #tpu.memory_space<vmem>>, vector<128x32xbf16>
    %cst_59 = arith.constant dense<0.000000e+00> : vector<8x32xf32>
    %90 = tpu.matmul %88, %89, %cst_59 {dimension_numbers = #tpu.dot_dimension_numbers<[1], [0], [0], [1], [0, 0, 1, 1], [], []>} : vector<8x128xbf16>, vector<128x32xbf16>, vector<8x32xf32> -> vector<8x32xf32>
    %c0_60 = arith.constant 0 : index
    %c0_61 = arith.constant 0 : index
    %91 = vector.load %arg14[%c0_60, %c0_61] : memref<1x32xf32, #tpu.memory_space<vmem>>, vector<1x32xf32>
    %92 = vector.broadcast %91 : vector<1x32xf32> to vector<8x32xf32>
    %93 = arith.addf %90, %92 : vector<8x32xf32>
    %94 = arith.addf %79, %93 : vector<8x32xf32>
    %c0_62 = arith.constant 0 : index
    %c0_63 = arith.constant 0 : index
    %95 = vector.load %arg17[%c0_62, %c0_63] : memref<1x32xf32, #tpu.memory_space<vmem>>, vector<1x32xf32>
    %c0_64 = arith.constant 0 : index
    %c0_65 = arith.constant 0 : index
    %96 = vector.load %arg18[%c0_64, %c0_65] : memref<1x32xf32, #tpu.memory_space<vmem>>, vector<1x32xf32>
    %cst_66 = arith.constant dense<0.000000e+00> : vector<8xf32>
    %97 = vector.multi_reduction <add>, %94, %cst_66 [1] : vector<8x32xf32> to vector<8xf32>
    %98 = vector.shape_cast %97 : vector<8xf32> to vector<8x1xf32>
    %cst_67 = arith.constant 3.200000e+01 : f32
    %99 = vector.broadcast %cst_67 : f32 to vector<8x1xf32>
    %100 = arith.divf %98, %99 : vector<8x1xf32>
    %101 = vector.broadcast %100 : vector<8x1xf32> to vector<8x32xf32>
    %102 = arith.subf %94, %101 : vector<8x32xf32>
    %103 = arith.mulf %102, %102 : vector<8x32xf32>
    %cst_68 = arith.constant dense<0.000000e+00> : vector<8xf32>
    %104 = vector.multi_reduction <add>, %103, %cst_68 [1] : vector<8x32xf32> to vector<8xf32>
    %105 = vector.shape_cast %104 : vector<8xf32> to vector<8x1xf32>
    %cst_69 = arith.constant 3.200000e+01 : f32
    %106 = vector.broadcast %cst_69 : f32 to vector<8x1xf32>
    %107 = arith.divf %105, %106 : vector<8x1xf32>
    %108 = vector.broadcast %100 : vector<8x1xf32> to vector<8x32xf32>
    %109 = arith.subf %94, %108 : vector<8x32xf32>
    %cst_70 = arith.constant 9.99999974E-6 : f32
    %110 = vector.broadcast %cst_70 : f32 to vector<8x1xf32>
    %111 = arith.addf %107, %110 : vector<8x1xf32>
    %112 = math.rsqrt %111 : vector<8x1xf32>
    %113 = vector.broadcast %112 : vector<8x1xf32> to vector<8x32xf32>
    %114 = arith.mulf %109, %113 : vector<8x32xf32>
    %115 = vector.broadcast %95 : vector<1x32xf32> to vector<8x32xf32>
    %116 = arith.mulf %114, %115 : vector<8x32xf32>
    %117 = vector.broadcast %96 : vector<1x32xf32> to vector<8x32xf32>
    %118 = arith.addf %116, %117 : vector<8x32xf32>
    %c0_71 = arith.constant 0 : index
    %c0_72 = arith.constant 0 : index
    %119 = vector.load %arg23[%c0_71, %c0_72] : memref<8x32xf32, #tpu.memory_space<vmem>>, vector<8x32xf32>
    tpu.vector_store %arg23[%c0_71, %c0_72], %118 {strides = array<i32>} : memref<8x32xf32, #tpu.memory_space<vmem>>, vector<8x32xf32>,
    return
  }
  func.func @transform_0(%arg0: i32) -> (i32, i32) {
    %c0_i32 = arith.constant 0 : i32
    %c0_i32_0 = arith.constant 0 : i32
    return %arg0, %c0_i32 : i32, i32
  }
  func.func @transform_1(%arg0: i32) -> (i32, i32) {
    %c0_i32 = arith.constant 0 : i32
    %c0_i32_0 = arith.constant 0 : i32
    return %arg0, %c0_i32 : i32, i32
  }
  func.func @transform_2(%arg0: i32) -> (i32, i32) {
    %c0_i32 = arith.constant 0 : i32
    %c0_i32_0 = arith.constant 0 : i32
    %c0_i32_1 = arith.constant 0 : i32
    return %c0_i32, %c0_i32_0 : i32, i32
  }
  func.func @transform_3(%arg0: i32) -> (i32, i32) {
    %c0_i32 = arith.constant 0 : i32
    %c0_i32_0 = arith.constant 0 : i32
    %c0_i32_1 = arith.constant 0 : i32
    return %c0_i32, %c0_i32_0 : i32, i32
  }
  func.func @transform_4(%arg0: i32) -> (i32, i32) {
    %c0_i32 = arith.constant 0 : i32
    %c0_i32_0 = arith.constant 0 : i32
    %c0_i32_1 = arith.constant 0 : i32
    return %c0_i32, %c0_i32_0 : i32, i32
  }
  func.func @transform_5(%arg0: i32) -> (i32, i32) {
    %c0_i32 = arith.constant 0 : i32
    %c0_i32_0 = arith.constant 0 : i32
    %c0_i32_1 = arith.constant 0 : i32
    return %c0_i32, %c0_i32_0 : i32, i32
  }
  func.func @transform_6(%arg0: i32) -> (i32, i32) {
    %c0_i32 = arith.constant 0 : i32
    %c0_i32_0 = arith.constant 0 : i32
    %c0_i32_1 = arith.constant 0 : i32
    return %c0_i32, %c0_i32_0 : i32, i32
  }
  func.func @transform_7(%arg0: i32) -> (i32, i32) {
    %c0_i32 = arith.constant 0 : i32
    %c0_i32_0 = arith.constant 0 : i32
    %c0_i32_1 = arith.constant 0 : i32
    return %c0_i32, %c0_i32_0 : i32, i32
  }
  func.func @transform_8(%arg0: i32) -> (i32, i32) {
    %c0_i32 = arith.constant 0 : i32
    %c0_i32_0 = arith.constant 0 : i32
    %c0_i32_1 = arith.constant 0 : i32
    return %c0_i32, %c0_i32_0 : i32, i32
  }
  func.func @transform_9(%arg0: i32) -> (i32, i32) {
    %c0_i32 = arith.constant 0 : i32
    %c0_i32_0 = arith.constant 0 : i32
    %c0_i32_1 = arith.constant 0 : i32
    return %c0_i32, %c0_i32_0 : i32, i32
  }
  func.func @transform_10(%arg0: i32) -> (i32, i32) {
    %c0_i32 = arith.constant 0 : i32
    %c0_i32_0 = arith.constant 0 : i32
    %c0_i32_1 = arith.constant 0 : i32
    return %c0_i32, %c0_i32_0 : i32, i32
  }
  func.func @transform_11(%arg0: i32) -> (i32, i32) {
    %c0_i32 = arith.constant 0 : i32
    %c0_i32_0 = arith.constant 0 : i32
    %c0_i32_1 = arith.constant 0 : i32
    return %c0_i32, %c0_i32_0 : i32, i32
  }
  func.func @transform_12(%arg0: i32) -> (i32, i32) {
    %c0_i32 = arith.constant 0 : i32
    %c0_i32_0 = arith.constant 0 : i32
    %c0_i32_1 = arith.constant 0 : i32
    return %c0_i32, %c0_i32_0 : i32, i32
  }
  func.func @transform_13(%arg0: i32) -> (i32, i32) {
    %c0_i32 = arith.constant 0 : i32
    %c0_i32_0 = arith.constant 0 : i32
    %c0_i32_1 = arith.constant 0 : i32
    return %c0_i32, %c0_i32_0 : i32, i32
  }
  func.func @transform_14(%arg0: i32) -> (i32, i32) {
    %c0_i32 = arith.constant 0 : i32
    %c0_i32_0 = arith.constant 0 : i32
    %c0_i32_1 = arith.constant 0 : i32
    return %c0_i32, %c0_i32_0 : i32, i32
  }
  func.func @transform_15(%arg0: i32) -> (i32, i32) {
    %c0_i32 = arith.constant 0 : i32
    %c0_i32_0 = arith.constant 0 : i32
    %c0_i32_1 = arith.constant 0 : i32
    return %c0_i32, %c0_i32_0 : i32, i32
  }
  func.func @transform_16(%arg0: i32) -> (i32, i32) {
    %c0_i32 = arith.constant 0 : i32
    %c0_i32_0 = arith.constant 0 : i32
    %c0_i32_1 = arith.constant 0 : i32
    return %c0_i32, %c0_i32_0 : i32, i32
  }
  func.func @transform_17(%arg0: i32) -> (i32, i32) {
    %c0_i32 = arith.constant 0 : i32
    %c0_i32_0 = arith.constant 0 : i32
    %c0_i32_1 = arith.constant 0 : i32
    return %c0_i32, %c0_i32_0 : i32, i32
  }
  func.func @transform_18(%arg0: i32) -> (i32, i32) {
    %c0_i32 = arith.constant 0 : i32
    %c0_i32_0 = arith.constant 0 : i32
    %c0_i32_1 = arith.constant 0 : i32
    return %c0_i32, %c0_i32_0 : i32, i32
  }
  func.func @transform_19(%arg0: i32) -> (i32, i32) {
    %c0_i32 = arith.constant 0 : i32
    %c0_i32_0 = arith.constant 0 : i32
    %c0_i32_1 = arith.constant 0 : i32
    return %c0_i32, %c0_i32_0 : i32, i32
  }
  func.func @transform_20(%arg0: i32) -> (i32, i32) {
    %c0_i32 = arith.constant 0 : i32
    %c0_i32_0 = arith.constant 0 : i32
    %c0_i32_1 = arith.constant 0 : i32
    return %c0_i32, %c0_i32_0 : i32, i32
  }
  func.func @transform_21(%arg0: i32) -> (i32, i32) {
    %c0_i32 = arith.constant 0 : i32
    %c0_i32_0 = arith.constant 0 : i32
    %c0_i32_1 = arith.constant 0 : i32
    return %c0_i32, %c0_i32_0 : i32, i32
  }
  func.func @transform_22(%arg0: i32) -> (i32, i32) {
    %c0_i32 = arith.constant 0 : i32
    %c0_i32_0 = arith.constant 0 : i32
    return %arg0, %c0_i32 : i32, i32
  }
  func.func @transform_23(%arg0: i32) -> (i32, i32) {
    %c0_i32 = arith.constant 0 : i32
    %c0_i32_0 = arith.constant 0 : i32
    return %arg0, %c0_i32 : i32, i32
  }
}

module attributes {stable_mosaic.version = 11 : i64} {
  func.func @bcab_branch_kernel(%arg0: i32, %arg1: memref<8x32xf32, #tpu.memory_space<vmem>>, %arg2: memref<16x32xf32, #tpu.memory_space<vmem>>, %arg3: memref<32x32xbf16, #tpu.memory_space<vmem>>, %arg4: memref<1x32xf32, #tpu.memory_space<vmem>>, %arg5: memref<32x32xbf16, #tpu.memory_space<vmem>>, %arg6: memref<1x32xf32, #tpu.memory_space<vmem>>, %arg7: memref<32x32xbf16, #tpu.memory_space<vmem>>, %arg8: memref<1x32xf32, #tpu.memory_space<vmem>>, %arg9: memref<32x32xbf16, #tpu.memory_space<vmem>>, %arg10: memref<1x32xf32, #tpu.memory_space<vmem>>, %arg11: memref<32x128xbf16, #tpu.memory_space<vmem>>, %arg12: memref<1x128xf32, #tpu.memory_space<vmem>>, %arg13: memref<128x32xbf16, #tpu.memory_space<vmem>>, %arg14: memref<1x32xf32, #tpu.memory_space<vmem>>, %arg15: memref<1x32xf32, #tpu.memory_space<vmem>>, %arg16: memref<1x32xf32, #tpu.memory_space<vmem>>, %arg17: memref<1x32xf32, #tpu.memory_space<vmem>>, %arg18: memref<1x32xf32, #tpu.memory_space<vmem>>, %arg19: memref<128x32xf32, #tpu.memory_space<vmem>>, %arg20: memref<128x32xf32, #tpu.memory_space<vmem>>, %arg21: memref<128x8xbf16, #tpu.memory_space<vmem>>, %arg22: memref<8x128xbf16, #tpu.memory_space<vmem>>, %arg23: memref<8x32xf32, #tpu.memory_space<vmem>>, %arg24: memref<8x128xf32, #tpu.memory_space<vmem>>, %arg25: memref<8x32xf32, #tpu.memory_space<vmem>>) attributes {dimension_semantics = [#tpu.dimension_semantics<parallel>], iteration_bounds = array<i64: 2>, scalar_prefetch = 0 : i64, scratch_operands = 1 : i64, tpu.core_type = #tpu.core_type<tc>, window_params = [{transform_indices = @transform_0, window_bounds = array<i64: 8, 32>}, {transform_indices = @transform_1, window_bounds = array<i64: 16, 32>}, {pipeline_mode = #tpu.pipeline_mode<synchronous>, transform_indices = @transform_2, window_bounds = array<i64: 32, 32>}, {pipeline_mode = #tpu.pipeline_mode<synchronous>, transform_indices = @transform_3, window_bounds = array<i64: 1, 32>}, {pipeline_mode = #tpu.pipeline_mode<synchronous>, transform_indices = @transform_4, window_bounds = array<i64: 32, 32>}, {pipeline_mode = #tpu.pipeline_mode<synchronous>, transform_indices = @transform_5, window_bounds = array<i64: 1, 32>}, {pipeline_mode = #tpu.pipeline_mode<synchronous>, transform_indices = @transform_6, window_bounds = array<i64: 32, 32>}, {pipeline_mode = #tpu.pipeline_mode<synchronous>, transform_indices = @transform_7, window_bounds = array<i64: 1, 32>}, {pipeline_mode = #tpu.pipeline_mode<synchronous>, transform_indices = @transform_8, window_bounds = array<i64: 32, 32>}, {pipeline_mode = #tpu.pipeline_mode<synchronous>, transform_indices = @transform_9, window_bounds = array<i64: 1, 32>}, {pipeline_mode = #tpu.pipeline_mode<synchronous>, transform_indices = @transform_10, window_bounds = array<i64: 32, 128>}, {pipeline_mode = #tpu.pipeline_mode<synchronous>, transform_indices = @transform_11, window_bounds = array<i64: 1, 128>}, {pipeline_mode = #tpu.pipeline_mode<synchronous>, transform_indices = @transform_12, window_bounds = array<i64: 128, 32>}, {pipeline_mode = #tpu.pipeline_mode<synchronous>, transform_indices = @transform_13, window_bounds = array<i64: 1, 32>}, {pipeline_mode = #tpu.pipeline_mode<synchronous>, transform_indices = @transform_14, window_bounds = array<i64: 1, 32>}, {pipeline_mode = #tpu.pipeline_mode<synchronous>, transform_indices = @transform_15, window_bounds = array<i64: 1, 32>}, {pipeline_mode = #tpu.pipeline_mode<synchronous>, transform_indices = @transform_16, window_bounds = array<i64: 1, 32>}, {pipeline_mode = #tpu.pipeline_mode<synchronous>, transform_indices = @transform_17, window_bounds = array<i64: 1, 32>}, {pipeline_mode = #tpu.pipeline_mode<synchronous>, transform_indices = @transform_18, window_bounds = array<i64: 128, 32>}, {pipeline_mode = #tpu.pipeline_mode<synchronous>, transform_indices = @transform_19, window_bounds = array<i64: 128, 32>}, {pipeline_mode = #tpu.pipeline_mode<synchronous>, transform_indices = @transform_20, window_bounds = array<i64: 128, 8>}, {pipeline_mode = #tpu.pipeline_mode<synchronous>, transform_indices = @transform_21, window_bounds = array<i64: 8, 128>}, {transform_indices = @transform_22, window_bounds = array<i64: 8, 32>}, {transform_indices = @transform_23, window_bounds = array<i64: 8, 128>}]} {
    %c0 = arith.constant 0 : index
    %c0_0 = arith.constant 0 : index
    %0 = vector.load %arg1[%c0, %c0_0] : memref<8x32xf32, #tpu.memory_space<vmem>>, vector<8x32xf32>
    %c0_1 = arith.constant 0 : index
    %c0_2 = arith.constant 0 : index
    %1 = vector.load %arg2[%c0_1, %c0_2] : memref<16x32xf32, #tpu.memory_space<vmem>>, vector<16x32xf32>
    %2 = arith.truncf %0 : vector<8x32xf32> to vector<8x32xbf16>
    %3 = arith.truncf %1 : vector<16x32xf32> to vector<16x32xbf16>
    %c0_3 = arith.constant 0 : index
    %c0_4 = arith.constant 0 : index
    %4 = vector.load %arg3[%c0_3, %c0_4] : memref<32x32xbf16, #tpu.memory_space<vmem>>, vector<32x32xbf16>
    %cst = arith.constant dense<0.000000e+00> : vector<8x32xf32>
    %5 = tpu.matmul %2, %4, %cst {dimension_numbers = #tpu.dot_dimension_numbers<[1], [0], [0], [1], [0, 0, 1, 1], [], []>} : vector<8x32xbf16>, vector<32x32xbf16>, vector<8x32xf32> -> vector<8x32xf32>
    %c0_5 = arith.constant 0 : index
    %c0_6 = arith.constant 0 : index
    %6 = vector.load %arg4[%c0_5, %c0_6] : memref<1x32xf32, #tpu.memory_space<vmem>>, vector<1x32xf32>
    %7 = vector.broadcast %6 : vector<1x32xf32> to vector<8x32xf32>
    %8 = arith.addf %5, %7 : vector<8x32xf32>
    %c0_7 = arith.constant 0 : index
    %c0_8 = arith.constant 0 : index
    %9 = vector.load %arg5[%c0_7, %c0_8] : memref<32x32xbf16, #tpu.memory_space<vmem>>, vector<32x32xbf16>
    %cst_9 = arith.constant dense<0.000000e+00> : vector<16x32xf32>
    %10 = tpu.matmul %3, %9, %cst_9 {dimension_numbers = #tpu.dot_dimension_numbers<[1], [0], [0], [1], [0, 0, 1, 1], [], []>} : vector<16x32xbf16>, vector<32x32xbf16>, vector<16x32xf32> -> vector<16x32xf32>
    %c0_10 = arith.constant 0 : index
    %c0_11 = arith.constant 0 : index
    %11 = vector.load %arg6[%c0_10, %c0_11] : memref<1x32xf32, #tpu.memory_space<vmem>>, vector<1x32xf32>
    %12 = vector.broadcast %11 : vector<1x32xf32> to vector<16x32xf32>
    %13 = arith.addf %10, %12 : vector<16x32xf32>
    %c0_12 = arith.constant 0 : index
    %c0_13 = arith.constant 0 : index
    %14 = vector.load %arg7[%c0_12, %c0_13] : memref<32x32xbf16, #tpu.memory_space<vmem>>, vector<32x32xbf16>
    %cst_14 = arith.constant dense<0.000000e+00> : vector<16x32xf32>
    %15 = tpu.matmul %3, %14, %cst_14 {dimension_numbers = #tpu.dot_dimension_numbers<[1], [0], [0], [1], [0, 0, 1, 1], [], []>} : vector<16x32xbf16>, vector<32x32xbf16>, vector<16x32xf32> -> vector<16x32xf32>
    %c0_15 = arith.constant 0 : index
    %c0_16 = arith.constant 0 : index
    %16 = vector.load %arg8[%c0_15, %c0_16] : memref<1x32xf32, #tpu.memory_space<vmem>>, vector<1x32xf32>
    %17 = vector.broadcast %16 : vector<1x32xf32> to vector<16x32xf32>
    %18 = arith.addf %15, %17 : vector<16x32xf32>
    %c0_17 = arith.constant 0 : index
    %c0_18 = arith.constant 0 : index
    %19 = vector.load %arg19[%c0_17, %c0_18] : memref<128x32xf32, #tpu.memory_space<vmem>>, vector<128x32xf32>
    %c0_19 = arith.constant 0 : index
    %c0_20 = arith.constant 0 : index
    %20 = vector.load %arg20[%c0_19, %c0_20] : memref<128x32xf32, #tpu.memory_space<vmem>>, vector<128x32xf32>
    %c0_21 = arith.constant 0 : index
    %c0_22 = arith.constant 0 : index
    %21 = vector.load %arg21[%c0_21, %c0_22] : memref<128x8xbf16, #tpu.memory_space<vmem>>, vector<128x8xbf16>
    %c0_23 = arith.constant 0 : index
    %c0_24 = arith.constant 0 : index
    %22 = vector.load %arg22[%c0_23, %c0_24] : memref<8x128xbf16, #tpu.memory_space<vmem>>, vector<8x128xbf16>
    %23 = tpu.concatenate %13, %13, %13, %13, %13, %13, %13, %13 in 0 : vector<16x32xf32>, vector<16x32xf32>, vector<16x32xf32>, vector<16x32xf32>, vector<16x32xf32>, vector<16x32xf32>, vector<16x32xf32>, vector<16x32xf32> -> vector<128x32xf32>
    %24 = arith.mulf %19, %23 : vector<128x32xf32>
    %25 = arith.truncf %24 : vector<128x32xf32> to vector<128x32xbf16>
    %26 = arith.truncf %8 : vector<8x32xf32> to vector<8x32xbf16>
    %cst_25 = arith.constant dense<0.000000e+00> : vector<8x128xf32>
    %27 = tpu.matmul %26, %25, %cst_25 {dimension_numbers = #tpu.dot_dimension_numbers<[1], [1], [0], [0], [0, 0, 1, 0], [], []>} : vector<8x32xbf16>, vector<128x32xbf16>, vector<8x128xf32> -> vector<8x128xf32>
    %cst_26 = arith.constant dense<0xFF800000> : vector<8xf32>
    %28 = vector.multi_reduction <maximumf>, %27, %cst_26 [1] : vector<8x128xf32> to vector<8xf32>
    %29 = vector.shape_cast %28 : vector<8xf32> to vector<8x1xf32>
    %30 = vector.broadcast %29 : vector<8x1xf32> to vector<8x128xf32>
    %31 = arith.subf %27, %30 : vector<8x128xf32>
    %32 = math.exp %31 : vector<8x128xf32>
    %33 = arith.truncf %32 : vector<8x128xf32> to vector<8x128xbf16>
    %cst_27 = arith.constant dense<0.000000e+00> : vector<8x8xf32>
    %34 = tpu.matmul %33, %21, %cst_27 {dimension_numbers = #tpu.dot_dimension_numbers<[1], [0], [0], [1], [0, 0, 1, 1], [], []>} : vector<8x128xbf16>, vector<128x8xbf16>, vector<8x8xf32> -> vector<8x8xf32>
    %cst_28 = arith.constant 1.000000e-30 : f32
    %35 = vector.broadcast %cst_28 : f32 to vector<8x8xf32>
    %36 = arith.maximumf %34, %35 : vector<8x8xf32>
    %37 = tpu.reciprocal %36 {approx = true} : vector<8x8xf32> -> vector<8x8xf32>
    %38 = arith.truncf %37 : vector<8x8xf32> to vector<8x8xbf16>
    %cst_29 = arith.constant dense<0.000000e+00> : vector<8x128xf32>
    %39 = tpu.matmul %38, %22, %cst_29 {dimension_numbers = #tpu.dot_dimension_numbers<[1], [0], [0], [1], [0, 0, 1, 1], [], []>} : vector<8x8xbf16>, vector<8x128xbf16>, vector<8x128xf32> -> vector<8x128xf32>
    %40 = arith.mulf %32, %39 : vector<8x128xf32>
    %c0_30 = arith.constant 0 : index
    %c0_31 = arith.constant 0 : index
    %41 = vector.load %arg24[%c0_30, %c0_31] : memref<8x128xf32, #tpu.memory_space<vmem>>, vector<8x128xf32>
    tpu.vector_store %arg24[%c0_30, %c0_31], %40 {strides = array<i32>} : memref<8x128xf32, #tpu.memory_space<vmem>>, vector<8x128xf32>,
    %42 = tpu.concatenate %18, %18, %18, %18, %18, %18, %18, %18 in 0 : vector<16x32xf32>, vector<16x32xf32>, vector<16x32xf32>, vector<16x32xf32>, vector<16x32xf32>, vector<16x32xf32>, vector<16x32xf32>, vector<16x32xf32> -> vector<128x32xf32>
    %43 = arith.mulf %20, %42 : vector<128x32xf32>
    %44 = arith.truncf %43 : vector<128x32xf32> to vector<128x32xbf16>
    %45 = arith.truncf %40 : vector<8x128xf32> to vector<8x128xbf16>
    %cst_32 = arith.constant dense<0.000000e+00> : vector<8x32xf32>
    %46 = tpu.matmul %45, %44, %cst_32 {dimension_numbers = #tpu.dot_dimension_numbers<[1], [0], [0], [1], [0, 0, 1, 1], [], []>} : vector<8x128xbf16>, vector<128x32xbf16>, vector<8x32xf32> -> vector<8x32xf32>
    %c0_33 = arith.constant 0 : index
    %c0_34 = arith.constant 0 : index
    %47 = vector.load %arg25[%c0_33, %c0_34] : memref<8x32xf32, #tpu.memory_space<vmem>>, vector<8x32xf32>
    tpu.vector_store %arg25[%c0_33, %c0_34], %46 {strides = array<i32>} : memref<8x32xf32, #tpu.memory_space<vmem>>, vector<8x32xf32>,
    %c0_35 = arith.constant 0 : index
    %c0_36 = arith.constant 0 : index
    %48 = vector.load %arg25[%c0_35, %c0_36] : memref<8x32xf32, #tpu.memory_space<vmem>>, vector<8x32xf32>
    %49 = arith.truncf %48 : vector<8x32xf32> to vector<8x32xbf16>
    %c0_37 = arith.constant 0 : index
    %c0_38 = arith.constant 0 : index
    %50 = vector.load %arg9[%c0_37, %c0_38] : memref<32x32xbf16, #tpu.memory_space<vmem>>, vector<32x32xbf16>
    %cst_39 = arith.constant dense<0.000000e+00> : vector<8x32xf32>
    %51 = tpu.matmul %49, %50, %cst_39 {dimension_numbers = #tpu.dot_dimension_numbers<[1], [0], [0], [1], [0, 0, 1, 1], [], []>} : vector<8x32xbf16>, vector<32x32xbf16>, vector<8x32xf32> -> vector<8x32xf32>
    %c0_40 = arith.constant 0 : index
    %c0_41 = arith.constant 0 : index
    %52 = vector.load %arg10[%c0_40, %c0_41] : memref<1x32xf32, #tpu.memory_space<vmem>>, vector<1x32xf32>
    %53 = vector.broadcast %52 : vector<1x32xf32> to vector<8x32xf32>
    %54 = arith.addf %51, %53 : vector<8x32xf32>
    %55 = arith.addf %0, %54 : vector<8x32xf32>
    %c0_42 = arith.constant 0 : index
    %c0_43 = arith.constant 0 : index
    %56 = vector.load %arg15[%c0_42, %c0_43] : memref<1x32xf32, #tpu.memory_space<vmem>>, vector<1x32xf32>
    %c0_44 = arith.constant 0 : index
    %c0_45 = arith.constant 0 : index
    %57 = vector.load %arg16[%c0_44, %c0_45] : memref<1x32xf32, #tpu.memory_space<vmem>>, vector<1x32xf32>
    %cst_46 = arith.constant dense<0.000000e+00> : vector<8xf32>
    %58 = vector.multi_reduction <add>, %55, %cst_46 [1] : vector<8x32xf32> to vector<8xf32>
    %59 = vector.shape_cast %58 : vector<8xf32> to vector<8x1xf32>
    %cst_47 = arith.constant 3.200000e+01 : f32
    %60 = vector.broadcast %cst_47 : f32 to vector<8x1xf32>
    %61 = arith.divf %59, %60 : vector<8x1xf32>
    %62 = vector.broadcast %61 : vector<8x1xf32> to vector<8x32xf32>
    %63 = arith.subf %55, %62 : vector<8x32xf32>
    %64 = arith.mulf %63, %63 : vector<8x32xf32>
    %cst_48 = arith.constant dense<0.000000e+00> : vector<8xf32>
    %65 = vector.multi_reduction <add>, %64, %cst_48 [1] : vector<8x32xf32> to vector<8xf32>
    %66 = vector.shape_cast %65 : vector<8xf32> to vector<8x1xf32>
    %cst_49 = arith.constant 3.200000e+01 : f32
    %67 = vector.broadcast %cst_49 : f32 to vector<8x1xf32>
    %68 = arith.divf %66, %67 : vector<8x1xf32>
    %69 = vector.broadcast %61 : vector<8x1xf32> to vector<8x32xf32>
    %70 = arith.subf %55, %69 : vector<8x32xf32>
    %cst_50 = arith.constant 9.99999974E-6 : f32
    %71 = vector.broadcast %cst_50 : f32 to vector<8x1xf32>
    %72 = arith.addf %68, %71 : vector<8x1xf32>
    %73 = math.rsqrt %72 : vector<8x1xf32>
    %74 = vector.broadcast %73 : vector<8x1xf32> to vector<8x32xf32>
    %75 = arith.mulf %70, %74 : vector<8x32xf32>
    %76 = vector.broadcast %56 : vector<1x32xf32> to vector<8x32xf32>
    %77 = arith.mulf %75, %76 : vector<8x32xf32>
    %78 = vector.broadcast %57 : vector<1x32xf32> to vector<8x32xf32>
    %79 = arith.addf %77, %78 : vector<8x32xf32>
    %80 = arith.truncf %79 : vector<8x32xf32> to vector<8x32xbf16>
    %c0_51 = arith.constant 0 : index
    %c0_52 = arith.constant 0 : index
    %81 = vector.load %arg11[%c0_51, %c0_52] : memref<32x128xbf16, #tpu.memory_space<vmem>>, vector<32x128xbf16>
    %cst_53 = arith.constant dense<0.000000e+00> : vector<8x128xf32>
    %82 = tpu.matmul %80, %81, %cst_53 {dimension_numbers = #tpu.dot_dimension_numbers<[1], [0], [0], [1], [0, 0, 1, 1], [], []>} : vector<8x32xbf16>, vector<32x128xbf16>, vector<8x128xf32> -> vector<8x128xf32>
    %c0_54 = arith.constant 0 : index
    %c0_55 = arith.constant 0 : index
    %83 = vector.load %arg12[%c0_54, %c0_55] : memref<1x128xf32, #tpu.memory_space<vmem>>, vector<1x128xf32>
    %84 = vector.broadcast %83 : vector<1x128xf32> to vector<8x128xf32>
    %85 = arith.addf %82, %84 : vector<8x128xf32>
    %cst_56 = arith.constant 0.000000e+00 : f32
    %86 = vector.broadcast %cst_56 : f32 to vector<8x128xf32>
    %87 = arith.maximumf %85, %86 : vector<8x128xf32>
    %88 = arith.truncf %87 : vector<8x128xf32> to vector<8x128xbf16>
    %c0_57 = arith.constant 0 : index
    %c0_58 = arith.constant 0 : index
    %89 = vector.load %arg13[%c0_57, %c0_58] : memref<128x32xbf16, #tpu.memory_space<vmem>>, vector<128x32xbf16>
    %cst_59 = arith.constant dense<0.000000e+00> : vector<8x32xf32>
    %90 = tpu.matmul %88, %89, %cst_59 {dimension_numbers = #tpu.dot_dimension_numbers<[1], [0], [0], [1], [0, 0, 1, 1], [], []>} : vector<8x128xbf16>, vector<128x32xbf16>, vector<8x32xf32> -> vector<8x32xf32>
    %c0_60 = arith.constant 0 : index
    %c0_61 = arith.constant 0 : index
    %91 = vector.load %arg14[%c0_60, %c0_61] : memref<1x32xf32, #tpu.memory_space<vmem>>, vector<1x32xf32>
    %92 = vector.broadcast %91 : vector<1x32xf32> to vector<8x32xf32>
    %93 = arith.addf %90, %92 : vector<8x32xf32>
    %94 = arith.addf %79, %93 : vector<8x32xf32>
    %c0_62 = arith.constant 0 : index
    %c0_63 = arith.constant 0 : index
    %95 = vector.load %arg17[%c0_62, %c0_63] : memref<1x32xf32, #tpu.memory_space<vmem>>, vector<1x32xf32>
    %c0_64 = arith.constant 0 : index
    %c0_65 = arith.constant 0 : index
    %96 = vector.load %arg18[%c0_64, %c0_65] : memref<1x32xf32, #tpu.memory_space<vmem>>, vector<1x32xf32>
    %cst_66 = arith.constant dense<0.000000e+00> : vector<8xf32>
    %97 = vector.multi_reduction <add>, %94, %cst_66 [1] : vector<8x32xf32> to vector<8xf32>
    %98 = vector.shape_cast %97 : vector<8xf32> to vector<8x1xf32>
    %cst_67 = arith.constant 3.200000e+01 : f32
    %99 = vector.broadcast %cst_67 : f32 to vector<8x1xf32>
    %100 = arith.divf %98, %99 : vector<8x1xf32>
    %101 = vector.broadcast %100 : vector<8x1xf32> to vector<8x32xf32>
    %102 = arith.subf %94, %101 : vector<8x32xf32>
    %103 = arith.mulf %102, %102 : vector<8x32xf32>
    %cst_68 = arith.constant dense<0.000000e+00> : vector<8xf32>
    %104 = vector.multi_reduction <add>, %103, %cst_68 [1] : vector<8x32xf32> to vector<8xf32>
    %105 = vector.shape_cast %104 : vector<8xf32> to vector<8x1xf32>
    %cst_69 = arith.constant 3.200000e+01 : f32
    %106 = vector.broadcast %cst_69 : f32 to vector<8x1xf32>
    %107 = arith.divf %105, %106 : vector<8x1xf32>
    %108 = vector.broadcast %100 : vector<8x1xf32> to vector<8x32xf32>
    %109 = arith.subf %94, %108 : vector<8x32xf32>
    %cst_70 = arith.constant 9.99999974E-6 : f32
    %110 = vector.broadcast %cst_70 : f32 to vector<8x1xf32>
    %111 = arith.addf %107, %110 : vector<8x1xf32>
    %112 = math.rsqrt %111 : vector<8x1xf32>
    %113 = vector.broadcast %112 : vector<8x1xf32> to vector<8x32xf32>
    %114 = arith.mulf %109, %113 : vector<8x32xf32>
    %115 = vector.broadcast %95 : vector<1x32xf32> to vector<8x32xf32>
    %116 = arith.mulf %114, %115 : vector<8x32xf32>
    %117 = vector.broadcast %96 : vector<1x32xf32> to vector<8x32xf32>
    %118 = arith.addf %116, %117 : vector<8x32xf32>
    %c0_71 = arith.constant 0 : index
    %c0_72 = arith.constant 0 : index
    %119 = vector.load %arg23[%c0_71, %c0_72] : memref<8x32xf32, #tpu.memory_space<vmem>>, vector<8x32xf32>
    tpu.vector_store %arg23[%c0_71, %c0_72], %118 {strides = array<i32>} : memref<8x32xf32, #tpu.memory_space<vmem>>, vector<8x32xf32>,
    return
  }
  func.func @transform_0(%arg0: i32) -> (i32, i32) {
    %c0_i32 = arith.constant 0 : i32
    %c0_i32_0 = arith.constant 0 : i32
    return %arg0, %c0_i32 : i32, i32
  }
  func.func @transform_1(%arg0: i32) -> (i32, i32) {
    %c0_i32 = arith.constant 0 : i32
    %c0_i32_0 = arith.constant 0 : i32
    return %arg0, %c0_i32 : i32, i32
  }
  func.func @transform_2(%arg0: i32) -> (i32, i32) {
    %c0_i32 = arith.constant 0 : i32
    %c0_i32_0 = arith.constant 0 : i32
    %c0_i32_1 = arith.constant 0 : i32
    return %c0_i32, %c0_i32_0 : i32, i32
  }
  func.func @transform_3(%arg0: i32) -> (i32, i32) {
    %c0_i32 = arith.constant 0 : i32
    %c0_i32_0 = arith.constant 0 : i32
    %c0_i32_1 = arith.constant 0 : i32
    return %c0_i32, %c0_i32_0 : i32, i32
  }
  func.func @transform_4(%arg0: i32) -> (i32, i32) {
    %c0_i32 = arith.constant 0 : i32
    %c0_i32_0 = arith.constant 0 : i32
    %c0_i32_1 = arith.constant 0 : i32
    return %c0_i32, %c0_i32_0 : i32, i32
  }
  func.func @transform_5(%arg0: i32) -> (i32, i32) {
    %c0_i32 = arith.constant 0 : i32
    %c0_i32_0 = arith.constant 0 : i32
    %c0_i32_1 = arith.constant 0 : i32
    return %c0_i32, %c0_i32_0 : i32, i32
  }
  func.func @transform_6(%arg0: i32) -> (i32, i32) {
    %c0_i32 = arith.constant 0 : i32
    %c0_i32_0 = arith.constant 0 : i32
    %c0_i32_1 = arith.constant 0 : i32
    return %c0_i32, %c0_i32_0 : i32, i32
  }
  func.func @transform_7(%arg0: i32) -> (i32, i32) {
    %c0_i32 = arith.constant 0 : i32
    %c0_i32_0 = arith.constant 0 : i32
    %c0_i32_1 = arith.constant 0 : i32
    return %c0_i32, %c0_i32_0 : i32, i32
  }
  func.func @transform_8(%arg0: i32) -> (i32, i32) {
    %c0_i32 = arith.constant 0 : i32
    %c0_i32_0 = arith.constant 0 : i32
    %c0_i32_1 = arith.constant 0 : i32
    return %c0_i32, %c0_i32_0 : i32, i32
  }
  func.func @transform_9(%arg0: i32) -> (i32, i32) {
    %c0_i32 = arith.constant 0 : i32
    %c0_i32_0 = arith.constant 0 : i32
    %c0_i32_1 = arith.constant 0 : i32
    return %c0_i32, %c0_i32_0 : i32, i32
  }
  func.func @transform_10(%arg0: i32) -> (i32, i32) {
    %c0_i32 = arith.constant 0 : i32
    %c0_i32_0 = arith.constant 0 : i32
    %c0_i32_1 = arith.constant 0 : i32
    return %c0_i32, %c0_i32_0 : i32, i32
  }
  func.func @transform_11(%arg0: i32) -> (i32, i32) {
    %c0_i32 = arith.constant 0 : i32
    %c0_i32_0 = arith.constant 0 : i32
    %c0_i32_1 = arith.constant 0 : i32
    return %c0_i32, %c0_i32_0 : i32, i32
  }
  func.func @transform_12(%arg0: i32) -> (i32, i32) {
    %c0_i32 = arith.constant 0 : i32
    %c0_i32_0 = arith.constant 0 : i32
    %c0_i32_1 = arith.constant 0 : i32
    return %c0_i32, %c0_i32_0 : i32, i32
  }
  func.func @transform_13(%arg0: i32) -> (i32, i32) {
    %c0_i32 = arith.constant 0 : i32
    %c0_i32_0 = arith.constant 0 : i32
    %c0_i32_1 = arith.constant 0 : i32
    return %c0_i32, %c0_i32_0 : i32, i32
  }
  func.func @transform_14(%arg0: i32) -> (i32, i32) {
    %c0_i32 = arith.constant 0 : i32
    %c0_i32_0 = arith.constant 0 : i32
    %c0_i32_1 = arith.constant 0 : i32
    return %c0_i32, %c0_i32_0 : i32, i32
  }
  func.func @transform_15(%arg0: i32) -> (i32, i32) {
    %c0_i32 = arith.constant 0 : i32
    %c0_i32_0 = arith.constant 0 : i32
    %c0_i32_1 = arith.constant 0 : i32
    return %c0_i32, %c0_i32_0 : i32, i32
  }
  func.func @transform_16(%arg0: i32) -> (i32, i32) {
    %c0_i32 = arith.constant 0 : i32
    %c0_i32_0 = arith.constant 0 : i32
    %c0_i32_1 = arith.constant 0 : i32
    return %c0_i32, %c0_i32_0 : i32, i32
  }
  func.func @transform_17(%arg0: i32) -> (i32, i32) {
    %c0_i32 = arith.constant 0 : i32
    %c0_i32_0 = arith.constant 0 : i32
    %c0_i32_1 = arith.constant 0 : i32
    return %c0_i32, %c0_i32_0 : i32, i32
  }
  func.func @transform_18(%arg0: i32) -> (i32, i32) {
    %c0_i32 = arith.constant 0 : i32
    %c0_i32_0 = arith.constant 0 : i32
    %c0_i32_1 = arith.constant 0 : i32
    return %c0_i32, %c0_i32_0 : i32, i32
  }
  func.func @transform_19(%arg0: i32) -> (i32, i32) {
    %c0_i32 = arith.constant 0 : i32
    %c0_i32_0 = arith.constant 0 : i32
    %c0_i32_1 = arith.constant 0 : i32
    return %c0_i32, %c0_i32_0 : i32, i32
  }
  func.func @transform_20(%arg0: i32) -> (i32, i32) {
    %c0_i32 = arith.constant 0 : i32
    %c0_i32_0 = arith.constant 0 : i32
    %c0_i32_1 = arith.constant 0 : i32
    return %c0_i32, %c0_i32_0 : i32, i32
  }
  func.func @transform_21(%arg0: i32) -> (i32, i32) {
    %c0_i32 = arith.constant 0 : i32
    %c0_i32_0 = arith.constant 0 : i32
    %c0_i32_1 = arith.constant 0 : i32
    return %c0_i32, %c0_i32_0 : i32, i32
  }
  func.func @transform_22(%arg0: i32) -> (i32, i32) {
    %c0_i32 = arith.constant 0 : i32
    %c0_i32_0 = arith.constant 0 : i32
    return %arg0, %c0_i32 : i32, i32
  }
  func.func @transform_23(%arg0: i32) -> (i32, i32) {
    %c0_i32 = arith.constant 0 : i32
    %c0_i32_0 = arith.constant 0 : i32
    return %arg0, %c0_i32 : i32, i32
  }
}

</mosaic_0001>

<bundles_post_ra>
// kernel: tpu_custom_call.1
= control target key start
LH: loop header
LB: loop body
LE: loop exit
PB: predicated region body
PF: predicated region fallthrough
CT: control target
= control target key end

     0   :  { %s2792_s0 = inlined_call_operand.vmem [shape: f32[16,32], index: 0, kind: input, shape index: {}]   ;;  %s2793_s1 = inlined_call_operand.vmem [shape: f32[32,32], index: 1, kind: input, shape index: {}]   ;;  %s2794_s2 = inlined_call_operand.vmem [shape: bf16[32,32], index: 2, kind: input, shape index: {}]   ;;  %s2795_s3 = inlined_call_operand.vmem [shape: f32[1,32], index: 3, kind: input, shape index: {}]   ;;  %s2796_s4 = inlined_call_operand.vmem [shape: bf16[32,32], index: 4, kind: input, shape index: {}]   ;;  %s2797_s5 = inlined_call_operand.vmem [shape: f32[1,32], index: 5, kind: input, shape index: {}]   ;;  %s2798_s6 = inlined_call_operand.vmem [shape: bf16[32,32], index: 6, kind: input, shape index: {}]   ;;  %s2799_s7 = inlined_call_operand.vmem [shape: f32[1,32], index: 7, kind: input, shape index: {}]   ;;  %s2800_s8 = inlined_call_operand.vmem [shape: bf16[32,32], index: 8, kind: input, shape index: {}]   ;;  %s2801_s9 = inlined_call_operand.vmem [shape: f32[1,32], index: 9, kind: input, shape index: {}]   ;;  %s2802_s10 = inlined_call_operand.vmem [shape: bf16[32,128], index: 10, kind: input, shape index: {}]   ;;  %s2803_s11 = inlined_call_operand.vmem [shape: f32[1,128], index: 11, kind: input, shape index: {}]   ;;  %s2804_s12 = inlined_call_operand.vmem [shape: bf16[128,32], index: 12, kind: input, shape index: {}]   ;;  %s2805_s13 = inlined_call_operand.vmem [shape: f32[1,32], index: 13, kind: input, shape index: {}]   ;;  %s2806_s14 = inlined_call_operand.vmem [shape: f32[1,32], index: 14, kind: input, shape index: {}]   ;;  %s2807_s15 = inlined_call_operand.vmem [shape: f32[1,32], index: 15, kind: input, shape index: {}]   ;;  %s2808_s16 = inlined_call_operand.vmem [shape: f32[1,32], index: 16, kind: input, shape index: {}]   ;;  %s2809_s17 = inlined_call_operand.vmem [shape: f32[1,32], index: 17, kind: input, shape index: {}]   ;;  %s2810_s18 = inlined_call_operand.vmem [shape: f32[128,32], index: 18, kind: input, shape index: {}]   ;;  %s2811_s19 = inlined_call_operand.vmem [shape: f32[128,32], index: 19, kind: input, shape index: {}]   ;;  %s2812_s20 = inlined_call_operand.vmem [shape: bf16[128,8], index: 20, kind: input, shape index: {}]   ;;  %s2813_s21 = inlined_call_operand.vmem [shape: bf16[8,128], index: 21, kind: input, shape index: {}]   ;;  %s2814_s22 = inlined_call_operand.hbm [shape: f32[16,32], index: 22, kind: output, shape index: {0}]   ;;  %s2815_s23 = inlined_call_operand.hbm [shape: f32[16,128], index: 23, kind: output, shape index: {1}]  }
   0x1   :  { %2830 = sst [smem:[#allocation15_spill]] %s2792_s0 }
   0x2   :  { %2831 = sst [smem:[#allocation16_spill]] %s2793_s1 }
   0x3   :  { %2832 = sst [smem:[#allocation17_spill]] %s2794_s2 }
   0x4   :  { %2833 = sst [smem:[#allocation18_spill]] %s2795_s3 }
   0x5   :  { %2834 = sst [smem:[#allocation19_spill]] %s2796_s4 }
   0x6   :  { %2835 = sst [smem:[#allocation20_spill]] %s2797_s5 }
   0x7   :  { %2836 = sst [smem:[#allocation21_spill]] %s2798_s6 }
   0x8   :  { %2837 = sst [smem:[#allocation22_spill]] %s2799_s7 }
   0x9   :  { %2838 = sst [smem:[#allocation23_spill]] %s2800_s8 }
   0xa   :  { %2839 = sst [smem:[#allocation24_spill]] %s2801_s9 }
   0xb   :  { %2840 = sst [smem:[#allocation25_spill]] %s2814_s22 }
   0xc   :  { %29 = vsyncpa [#allocation4], 0 }
   0xd   :  { %31 = vsyncpa [#allocation4 + $0x1], 0 }
   0xe   :  { %32 = vsyncpa [#allocation6], 0 }
   0xf   :  { %34 = vsyncpa [#allocation6 + $0x1], 0  ;;  %s2279_s4 = smov 0   ;;  %s2281_s30 = smov 0  }
  0x10   :  { %s2283_s24 = smov 0   ;;  %s2285_s25 = smov 0  }
  0x11 LB: > { %2841 = sst [smem:[#allocation9_spill]] %s2141_s4  ;;  %s2300_s5 = sadd.s32 4294967295, %s2153_s25   ;;  %s2153_s25 = sphi %s2285_s25, %s2866_s25   ;;  %s2149_s24 = sphi %s2283_s24, %s2868_s24   ;;  %s2145_s30 = sphi %s2281_s30, %s2870_s30   ;;  %s2141_s4 = sphi %s2279_s4, %s2869_s4  }
  0x12   : > { %2842 = sst [smem:[#allocation10_spill]] %s2149_s24  ;;  %s1742_s1 = sadd.s32 4294967294, %s2153_s25  }
  0x13   : > { %2843 = sst [smem:[#allocation11_spill]] %s2153_s25  ;;  %s2304_s26 = sadd.s32 1, %s2153_s25  }
  0x14   : > { %2844 = sst [smem:[#allocation12_spill]] %s2304_s26  ;;  %s519_s2 = sadd.s32 1, %s2149_s24 }
  0x15   : > { %s516_s6 = ssub.s32 %s2153_s25, %s2304_s26  ;;  %p529_p0 = scmp.ne.s32.totalorder %s2149_s24, %s2145_s30 }
  0x16   : > { %p517_p1 = scmp.eq.s32.totalorder %s516_s6, 0  ;;  %p530_p2 = scmp.eq.s32.totalorder %s2300_s5, 1 }
  0x17   : > { %p535_p3 = scmp.ne.s32.totalorder %s2145_s30, %s2141_s4  ;;  %p536_p4 = scmp.eq.s32.totalorder %s1742_s1, 1 }
  0x18   : > { %s2315_s27 = scalar_select %p517_p1, %s2149_s24, %s519_s2  }
  0x19   : > { %p2317_p5 = por %p530_p2, %p529_p0  ;;  %p2321_p6 = por %p536_p4, %p535_p3 }
  0x1a   : > { %2845 = sst [smem:[#allocation13_spill]] %s2315_s27  ;;  %p1745_p7 = scmp.ge.s32.totalorder %s2153_s25, 1 }
  0x1b   : > { %s2847_s28 = scalar_select %p2321_p6, 1, 0 }
  0x1c   : > { %p656_p8 = scmp.lt.s32.totalorder %s2153_s25, 3 }
  0x1d   : > { %2848 = sst [smem:[#allocation14_spill]] %s2847_s28 }
  0x1e   : > { %p657_p9 = pnand %p1745_p7, %p656_p8 }
  0x1f   : > { %s2849_s0 = sld [smem:[#allocation17_spill]] (!%p657_p9)  ;;  %v2155_v1 = vmov (!%p657_p9), 0.0   ;;  %vm2156_vm0 = vmmov (!%p657_p9), 0   ;;  %p729_p10 = scmp.lt.s32.totalorder (!%p657_p9), %s2300_s5, 1  ;;  %vm768_vm1 = vcmask (!%p657_p9), 261120   ;;  %v943_v17 = vld [vmem:[%s2810_s18] sm:$0xff] (!%p657_p9) }
  0x20   : > { %660 = sbr.rel (%p657_p9) target bundleno = 2666 (0xa6a), region = 108  ;;  %1853 = vmatprep.subr.bf16.mxu1 (!%p657_p9), %v2155_v1  ;;  %1897 = vmatprep.subr.bf16.mxu0 (!%p657_p9), %v2155_v1  ;;  %s1749_s6 = sshll.u32 (!%p657_p9), %s2300_s5, 1  ;;  %v945_v18 = vld [vmem:[%s2810_s18 + $0x10] sm:$0xff] (!%p657_p9)  ;;  %v947_v19 = vld [vmem:[%s2810_s18 + $0x20] sm:$0xff] (!%p657_p9)  ;;  %v944_v21 = vld [vmem:[%s2810_s18 + $0x8] sm:$0xff] (!%p657_p9)  ;;  %vm1185_vm2 = vcmask (!%p657_p9), 1043456  }
  0x21   : > { %1857 = vmatprep.mubr.msk.bf16.mxu1 (!%p657_p9), %vm2156_vm0, %v2155_v1  ;;  %1913 = vmatprep.mubr.msk.bf16.mxu0 (!%p657_p9), %vm2156_vm0, %v2155_v1  ;;  %p734_p11 = scmp.lt.s32.totalorder (!%p657_p9), %s1749_s6, 3  ;;  %s2850_s1 = sld [smem:[#allocation19_spill]] (!%p657_p9)  ;;  %v949_v22 = vld [vmem:[%s2810_s18 + $0x30] sm:$0xff] (!%p657_p9)  ;;  %v951_v23 = vld [vmem:[%s2810_s18 + $0x40] sm:$0xff] (!%p657_p9)  ;;  %v946_v26 = vld [vmem:[%s2810_s18 + $0x18] sm:$0xff] (!%p657_p9)  ;;  %vm1181_vm3 = vcmask (!%p657_p9), 64512  }
  0x22   : > { %s2851_s26 = sld [smem:[#allocation15_spill]] (!%p657_p9)  ;;  %s2852_s22 = sld [smem:[#allocation16_spill]] (!%p657_p9)  ;;  %v953_v27 = vld [vmem:[%s2810_s18 + $0x50] sm:$0xff] (!%p657_p9)  ;;  %v955_v28 = vld [vmem:[%s2810_s18 + $0x60] sm:$0xff] (!%p657_p9)  ;;  %v948_v30 = vld [vmem:[%s2810_s18 + $0x28] sm:$0xff] (!%p657_p9) }
  0x23   : > { %s2854_s2 = sld [smem:[#allocation20_spill]] (!%p657_p9)  ;;  %v950_v31 = vld [vmem:[%s2810_s18 + $0x38] sm:$0xff] (!%p657_p9)  ;;  %v952_v32 = vld [vmem:[%s2810_s18 + $0x48] sm:$0xff] (!%p657_p9)  ;;  %v957_v40 = vld [vmem:[%s2810_s18 + $0x70] sm:$0xff] (!%p657_p9)  ;;  %s2856_s24 = sld [smem:[#allocation22_spill]] (!%p657_p9) }
  0x24   : > { %v954_v38 = vld [vmem:[%s2810_s18 + $0x58] sm:$0xff] (!%p657_p9)  ;;  %v956_v39 = vld [vmem:[%s2810_s18 + $0x68] sm:$0xff] (!%p657_p9)  ;;  %s2627_s4 = sand.u32 (!%p657_p9), 1, %s2145_s30   ;;  %s2857_s8 = sld [smem:[#allocation23_spill]] (!%p657_p9) }
  0x25   : > { %v2025_v0 = vld [vmem:[%s2849_s0] sm:$0xff] (!%p657_p9)   ;;  %v2026_v2 = vld [vmem:[%s2849_s0 + $0x8] sm:$0xff] (!%p657_p9)   ;;  %v958_v49 = vld [vmem:[%s2810_s18 + $0x78] sm:$0xff] (!%p657_p9)  ;;  %s2828_s25 = sshll.u32 (!%p657_p9), %s2627_s4, 3  ;;  %s2858_s9 = sld [smem:[#allocation24_spill]] (!%p657_p9) }
  0x26   : > { %1854 = vmatpush3.bf16.msra.mxu1 (!%p657_p9), %v2025_v0  ;;  %s2829_s27 = sshll.u32 (!%p657_p9), %s2300_s5, 7 }
  0x27   : > { %1855 = vmatprep.subr.bf16.mxu1 %v2155_v1  ;;  %s730_s29 = scalar_select %p729_p10, %s2300_s5, 1  ;;  %v2027_v3 = vld [vmem:[%s2850_s1] sm:$0xff]   ;;  %v2028_v6 = vld [vmem:[%s2850_s1 + $0x8] sm:$0xff]  }
  0x28   : > { %s2872_s6 = smov (!%p734_p11, %s1749_s6), 3  ;;  %s2632_s1 = scalar_lea.vmem [#allocation5], %s2828_s25 }
  0x29   : > { %s1748_s3 = sshll.u32 %s730_s29, 3  ;;  %s1750_s29 = sshll.u32 %s2872_s6, 3  ;;  %v1755_v16 = vld [vmem:[%s2854_s2] ss:$0 sm:$0xff] }
  0x2a   : > { %1856 = vmatpush3.bf16.msra.mxu1 %v2026_v2  ;;  %s732_s28 = scalar_lea.vmem %s2851_s26, %s1748_s3  ;;  %s737_s0 = scalar_lea.vmem %s2852_s22, %s1750_s29 }
  0x2b   : > { %1861 = vmatprep.subr.bf16.mxu1 %v2155_v1  ;;  %v2350_v4 = vld [vmem:[%s732_s28] sm:$0xff]  ;;  %v742_v8 = vld [vmem:[%s737_s0 + $0x8] sm:$0xff]  ;;  %s2853_s22 = sld [smem:[#allocation21_spill]]  ;;  %s2855_s3 = sld [smem:[#allocation18_spill]] }
  0x2c   : > { %v743_v5 = vpack.c.bf16 %v2350_v4, %v2350_v4  ;;  %v741_v7 = vld [vmem:[%s737_s0] sm:$0xff]  ;;  %s2714_s28 = scalar_lea.hbm %s2815_s23, %s2829_s27  ;;  %s1639_s6 = sshll.u32 %s2632_s1, 4  ;;  %s1640_s6 = int_to_ptr.vmem [resolvable:$true] %s1639_s6 }
  0x2d   : > { %v744_v9 = vpack.c.bf16 %v742_v8, %v741_v7  ;;  %s2059_s2 = scalar_lea.vmem %s1640_s6, 128  ;;  %s2157_s29 = smov [#allocation5]  }
  0x2e   : > { %1858 = vmatmul.mubr.msk.bf16.vlgmr.msra.gmra.mrb[0].mxu1 %vm768_vm1, %v743_v5  ;;  %p2060_p12 = scmp.ne.s32.totalorder %s1640_s6, %s2059_s2 }
  0x2f   : > { %1862 = vmatpush3.bf16.msra.mxu1 %v2027_v3  ;;  %1865 = vmatprep.mubr.msk.bf16.mxu1 %vm2156_vm0, %v2155_v1 }
  0x30   : > { %1863 = vmatprep.subr.bf16.mxu1 %v2155_v1  ;;  %p2061_p13 = pnand %p2060_p12, %p2317_p5 }
  0x31   : > { %v2029_v10 = vld [vmem:[%s2853_s22] sm:$0xff]   ;;  %v2030_v11 = vld [vmem:[%s2853_s22 + $0x8] sm:$0xff]  }
  0x32   : > { %v1751_v8 = vld [vmem:[%s2855_s3] ss:$0 sm:$0xff]  ;;  %s1613_s3 = scalar_lea.sflag [#allocation6], %s2627_s4  ;;  %p2062_p0 = pneg %p2061_p13 }
  0x33   : > { %1864 = vmatpush3.bf16.msra.mxu1 %v2028_v6 }
  0x34   : > { %1869 = vmatprep.subr.bf16.mxu1 %v2155_v1 }
  0x36   : > { %1866 = vmatmul.mubr.msk.bf16.vlgmr.msra.gmra.mrb[4].mxu1 %vm768_vm1, %v744_v9 }
  0x37   : > { %1873 = vmatprep.mubr.msk.bf16.mxu1 %vm2156_vm0, %v2155_v1  ;;  %1870 = vmatpush3.bf16.msra.mxu1 %v2029_v10 }
  0x38   : > { %1871 = vmatprep.subr.bf16.mxu1 %v2155_v1 }
  0x3b   : > { %1872 = vmatpush3.bf16.msra.mxu1 %v2030_v11 }
  0x3c   : > { %1877 = vmatprep.subr.bf16.mxu1 %v2155_v1 }
  0x3e   : > { %1874 = vmatmul.mubr.msk.bf16.vlgmr.msra.gmra.mrb[8].mxu1 %vm768_vm1, %v744_v9 }
  0x3f   : > { %1893 = vmatprep.mubr.msk.bf16.mxu1 %vm2156_vm0, %v2155_v1 }
 0x101   : > { %v2379_v12 = vpop.f32.mrb[0].mxu1 }
 0x102   : > { %v1859_v13 = vpop.f32.mrb[1].mxu1  ;;  %v807_v10 = vadd.f32 %v1751_v8, %v2379_v12  ;;  %v959_v12 = vld [vmem:[%s2811_s19] sm:$0xff]  ;;  %v2038_v8 = vld [vmem:[%s2812_s20 + $0x38] sm:$0xff]  }
 0x103   : > { %v809_v14 = vpop.f32.mrb[2].mxu1 }
 0x104   : > { %v1860_v15 = vpop.f32.mrb[3].mxu1  ;;  %v1016_v11 = vpack.c.bf16 %v807_v10, %v807_v10 }
 0x109   : > { %v872_v20 = vpop.f32.mrb[4].mxu1 }
 0x10a   : > { %v873_v24 = vadd.f32 %v1755_v16, %v872_v20  ;;  %v1867_v25 = vpop.f32.mrb[5].mxu1  ;;  %v960_v20 = vld [vmem:[%s2811_s19 + $0x8] sm:$0xff] }
 0x10b   : > { %v875_v29 = vpop.f32.mrb[6].mxu1 }
 0x10c   : > { %v876_v33 = vadd.f32 %v1755_v16, %v875_v29  ;;  %v1868_v34 = vpop.f32.mrb[7].mxu1  ;;  %v992_v35 = vmul.f32 %v943_v17, %v873_v24  ;;  %v994_v36 = vmul.f32 %v945_v18, %v873_v24  ;;  %v996_v37 = vmul.f32 %v947_v19, %v873_v24  ;;  %v1759_v17 = vld [vmem:[%s2856_s24] ss:$0 sm:$0xff]  ;;  %s2063_s24 = sshll.u32 %s2157_s29, 4  ;;  %s2064_s24 = int_to_ptr.vmem [resolvable:$false] %s2063_s24 }
 0x10d   : > { %v998_v41 = vmul.f32 %v949_v22, %v873_v24  ;;  %v1000_v42 = vmul.f32 %v951_v23, %v873_v24  ;;  %v1002_v43 = vmul.f32 %v953_v27, %v873_v24  ;;  %v1004_v44 = vmul.f32 %v955_v28, %v873_v24  ;;  %v964_v27 = vld [vmem:[%s2811_s19 + $0x28] sm:$0xff]  ;;  %s2065_s25 = scalar_lea.vmem %s2064_s24, 256  ;;  %p2066_p1 = scmp.lt.s32.totalorder %s1640_s6, %s2064_s24 }
 0x10e   : > { %v993_v45 = vmul.f32 %v944_v21, %v876_v33  ;;  %v995_v46 = vmul.f32 %v946_v26, %v876_v33  ;;  %v997_v47 = vmul.f32 %v948_v30, %v876_v33  ;;  %v999_v48 = vmul.f32 %v950_v31, %v876_v33  ;;  %v961_v21 = vld [vmem:[%s2811_s19 + $0x10] sm:$0xff]  ;;  %v963_v26 = vld [vmem:[%s2811_s19 + $0x20] sm:$0xff]  ;;  %p2067_p2 = scmp.lt.s32.totalorder %s2065_s25, %s2059_s2 }
 0x10f   : > { %v1001_v50 = vmul.f32 %v952_v32, %v876_v33  ;;  %v1003_v51 = vmul.f32 %v954_v38, %v876_v33  ;;  %v1005_v52 = vmul.f32 %v956_v39, %v876_v33  ;;  %v1006_v53 = vmul.f32 %v957_v40, %v873_v24  ;;  %v962_v24 = vld [vmem:[%s2811_s19 + $0x18] sm:$0xff]  ;;  %v965_v31 = vld [vmem:[%s2811_s19 + $0x30] sm:$0xff] }
 0x110   : > { %v1008_v54 = vpack.c.bf16 %v993_v45, %v992_v35  ;;  %v1009_v55 = vpack.c.bf16 %v995_v46, %v994_v36  ;;  %v1010_v56 = vpack.c.bf16 %v997_v47, %v996_v37  ;;  %v1011_v57 = vpack.c.bf16 %v999_v48, %v998_v41  ;;  %v966_v32 = vld [vmem:[%s2811_s19 + $0x38] sm:$0xff]  ;;  %v968_v37 = vld [vmem:[%s2811_s19 + $0x48] sm:$0xff]  ;;  %v969_v39 = vld [vmem:[%s2811_s19 + $0x50] sm:$0xff]  ;;  %p2068_p3 = por %p2067_p2, %p2066_p1 }
 0x111   : > { %v1012_v58 = vpack.c.bf16 %v1001_v50, %v1000_v42  ;;  %v1013_v59 = vpack.c.bf16 %v1003_v51, %v1002_v43  ;;  %v1014_v60 = vpack.c.bf16 %v1005_v52, %v1004_v44  ;;  %v1007_v61 = vmul.f32 %v958_v49, %v876_v33  ;;  %v936_v13 = vpop.f32.mrb[8].mxu1  ;;  %v967_v33 = vld [vmem:[%s2811_s19 + $0x40] sm:$0xff]  ;;  %v970_v40 = vld [vmem:[%s2811_s19 + $0x58] sm:$0xff]  ;;  %v972_v46 = vld [vmem:[%s2811_s19 + $0x68] sm:$0xff] }
 0x112   : > { %v1021_v62 = vsel %vm768_vm1, %v1008_v54, 0  ;;  %v1024_v0 = vsel %vm768_vm1, %v1009_v55, 0  ;;  %v1027_v2 = vsel %vm768_vm1, %v1010_v56, 0  ;;  %v1030_v3 = vsel %vm768_vm1, %v1011_v57, 0  ;;  %v1875_v14 = vpop.f32.mrb[9].mxu1  ;;  %v971_v45 = vld [vmem:[%s2811_s19 + $0x60] sm:$0xff]  ;;  %p2069_p4 = pnand %p2068_p3, %p2062_p0 }
 0x113   : > { %1878 = vmatpush3.bf16.xpose.msra.mxu1 %v1021_v62  ;;  %v1015_v63 = vpack.c.bf16 %v1007_v61, %v1006_v53  ;;  %v1033_v5 = vsel %vm768_vm1, %v1012_v58, 0  ;;  %v1036_v6 = vsel %vm768_vm1, %v1013_v59, 0  ;;  %v1039_v7 = vsel %vm768_vm1, %v1014_v60, 0  ;;  %v939_v15 = vpop.f32.mrb[10].mxu1  ;;  %v973_v47 = vld [vmem:[%s2811_s19 + $0x70] sm:$0xff]  ;;  %v974_v52 = vld [vmem:[%s2811_s19 + $0x78] sm:$0xff] }
 0x114   : > { %1879 = vmatprep.subr.bf16.mxu1 %v2155_v1  ;;  %v1876_v16 = vpop.f32.mrb[11].mxu1  ;;  %v937_v18 = vadd.f32 %v1759_v17, %v936_v13  ;;  %v940_v19 = vadd.f32 %v1759_v17, %v939_v15  ;;  %v2031_v59 = vld [vmem:[%s2812_s20] sm:$0xff]   ;;  %v2032_v60 = vld [vmem:[%s2812_s20 + $0x8] sm:$0xff]   ;;  %v2033_v61 = vld [vmem:[%s2812_s20 + $0x10] sm:$0xff]  }
 0x115   : > { %v1042_v9 = vsel %vm768_vm1, %v1015_v63, 0  ;;  %1898 = vmatpush3.bf16.msra.mxu0 %v2031_v59  ;;  %v2034_v62 = vld [vmem:[%s2812_s20 + $0x18] sm:$0xff]   ;;  %v991_v15 = vld [vmem:[%s2813_s21] sm:$0xf] }
 0x116   : > { %v2467_v22 = vmul.f32 %v959_v12, %v937_v18  ;;  %v2469_v23 = vmul.f32 %v960_v20, %v940_v19  ;;  %v2474_v25 = vmul.f32 %v961_v21, %v937_v18  ;;  %v2482_v28 = vmul.f32 %v962_v24, %v940_v19  ;;  %1899 = vmatprep.subr.bf16.mxu0 %v2155_v1 }
 0x117   : > { %v2484_v29 = vmul.f32 %v963_v26, %v937_v18  ;;  %v2486_v30 = vmul.f32 %v964_v27, %v940_v19  ;;  %v2499_v35 = vmul.f32 %v965_v31, %v937_v18  ;;  %v2501_v36 = vmul.f32 %v966_v32, %v940_v19 }
 0x118   : > { %v1247_v34 = vpack.c.bf16 %v2469_v23, %v2467_v22  ;;  %v2506_v38 = vmul.f32 %v967_v33, %v937_v18  ;;  %v1248_v41 = vpack.c.bf16 %v2482_v28, %v2474_v25  ;;  %v2518_v43 = vmul.f32 %v968_v37, %v940_v19  ;;  %v1773_v37 = vld [vmem:[%s2858_s9] ss:$0 sm:$0xff] }
 0x119   : > { %v1249_v42 = vpack.c.bf16 %v2486_v30, %v2484_v29  ;;  %v2520_v44 = vmul.f32 %v969_v39, %v937_v18  ;;  %v1250_v48 = vpack.c.bf16 %v2501_v36, %v2499_v35  ;;  %v2533_v49 = vmul.f32 %v970_v40, %v940_v19  ;;  %1900 = vmatpush3.bf16.msra.mxu0 %v2032_v60  ;;  %v2039_v29 = vld [vmem:[%s2857_s8] sm:$0xff]   ;;  %v2040_v30 = vld [vmem:[%s2857_s8 + $0x8] sm:$0xff]  }
 0x11a   : > { %v2535_v50 = vmul.f32 %v971_v45, %v937_v18  ;;  %v2537_v51 = vmul.f32 %v972_v46, %v940_v19  ;;  %v1251_v53 = vpack.c.bf16 %v2518_v43, %v2506_v38  ;;  %v2544_v54 = vmul.f32 %v973_v47, %v937_v18  ;;  %1901 = vmatprep.subr.bf16.mxu0 %v2155_v1 }
 0x11b   : > { %1880 = vmatpush3.bf16.xpose.msra.mxu1 %v1024_v0  ;;  %v2546_v55 = vmul.f32 %v974_v52, %v940_v19  ;;  %v1252_v56 = vpack.c.bf16 %v2533_v49, %v2520_v44  ;;  %v1187_v16 = vsel %vm1185_vm2, %v991_v15, 0  ;;  %v2044_v52 = vld [vmem:[%s2804_s12 + $0x8] sm:$0xff]  }
 0x11c   : > { %1881 = vmatprep.subr.bf16.mxu1 %v2155_v1  ;;  %v1253_v57 = vpack.c.bf16 %v2537_v51, %v2535_v50  ;;  %v2041_v50 = vld [vmem:[%s2802_s10] sm:$0xff]   ;;  %v2042_v51 = vld [vmem:[%s2802_s10 + $0x8] sm:$0xff]  }
 0x11d   : > { %v1254_v58 = vpack.c.bf16 %v2546_v55, %v2544_v54  ;;  %1902 = vmatpush3.bf16.msra.mxu0 %v2033_v61  ;;  %v2046_v54 = vld [vmem:[%s2804_s12 + $0x18] sm:$0xff]   ;;  %v2047_v55 = vld [vmem:[%s2804_s12 + $0x20] sm:$0xff]  }
 0x11e   : > { %1903 = vmatprep.subr.bf16.mxu0 %v2155_v1  ;;  %v1777_v61 = vld [vmem:[%s2806_s14] ss:$0 sm:$0xff] }
 0x121   : > { %1904 = vmatpush3.bf16.msra.mxu0 %v2034_v62 }
 0x122   : > { %1905 = vmatprep.subr.bf16.mxu0 %v2155_v1 }
 0x123   : > { %1882 = vmatpush3.bf16.xpose.msra.mxu1 %v1027_v2 }
 0x124   : > { %1883 = vmatprep.subr.bf16.mxu1 %v2155_v1 }
 0x12b   : > { %1884 = vmatpush3.bf16.xpose.msra.mxu1 %v1030_v3 }
 0x12c   : > { %1885 = vmatprep.subr.bf16.mxu1 %v2155_v1 }
 0x133   : > { %1886 = vmatpush3.bf16.xpose.msra.mxu1 %v1033_v5  ;;  %v2035_v5 = vld [vmem:[%s2812_s20 + $0x20] sm:$0xff]  }
 0x134   : > { %1887 = vmatprep.subr.bf16.mxu1 %v2155_v1  ;;  %1906 = vmatpush3.bf16.msra.mxu0 %v2035_v5  ;;  %v2049_v5 = vld [vmem:[%s2804_s12 + $0x30] sm:$0xff]  }
 0x135   : > { %1907 = vmatprep.subr.bf16.mxu0 %v2155_v1 }
 0x13b   : > { %1888 = vmatpush3.bf16.xpose.msra.mxu1 %v1036_v6  ;;  %v2036_v6 = vld [vmem:[%s2812_s20 + $0x28] sm:$0xff]  }
 0x13c   : > { %1889 = vmatprep.subr.bf16.mxu1 %v2155_v1  ;;  %1908 = vmatpush3.bf16.msra.mxu0 %v2036_v6  ;;  %v2050_v6 = vld [vmem:[%s2804_s12 + $0x38] sm:$0xff]  }
 0x13d   : > { %1909 = vmatprep.subr.bf16.mxu0 %v2155_v1 }
 0x143   : > { %1890 = vmatpush3.bf16.xpose.msra.mxu1 %v1039_v7  ;;  %v2037_v7 = vld [vmem:[%s2812_s20 + $0x30] sm:$0xff]  }
 0x144   : > { %1891 = vmatprep.subr.bf16.mxu1 %v2155_v1  ;;  %1910 = vmatpush3.bf16.msra.mxu0 %v2037_v7  ;;  %v1779_v7 = vld [vmem:[%s2803_s11] ss:$0 sm:$0xff] }
 0x145   : > { %1911 = vmatprep.subr.bf16.mxu0 %v2155_v1 }
 0x148   : > { %1912 = vmatpush3.bf16.msra.mxu0 %v2038_v8 }
 0x149   : > { %1917 = vmatprep.subr.bf16.mxu0 %v2155_v1 }
 0x14b   : > { %1892 = vmatpush3.bf16.xpose.msra.mxu1 %v1042_v9 }
 0x14c   : > { %1943 = vmatprep.subr.bf16.mxu1 %v2155_v1 }
 0x152   : > { %1894 = vmatmul.mubr.msk.bf16.vlgmr.msra.gmra.mrb[12].mxu1 %vm768_vm1, %v1016_v11 }
 0x153   : > { %1947 = vmatprep.mubr.msk.bf16.mxu1 %vm2156_vm0, %v2155_v1  ;;  %1944 = vmatpush3.bf16.msra.mxu1 %v2039_v29 }
 0x154   : > { %1945 = vmatprep.subr.bf16.mxu1 %v2155_v1 }
 0x157   : > { %1946 = vmatpush3.bf16.msra.mxu1 %v2040_v30 }
 0x158   : > { %1951 = vmatprep.subr.bf16.mxu1 %v2155_v1 }
 0x225   : > { %v1078_v63 = vpop.f32.mrb[12].mxu1 }
 0x226   : > { %1084 = vmax.xlane.f32.xlu0 %v1078_v63  ;;  %v1895_v0 = vpop.f32.mrb[13].mxu1 }
 0x227   : > { %v1081_v2 = vpop.f32.mrb[14].mxu1 }
 0x228   : > { %v1896_v3 = vpop.f32.mrb[15].mxu1 }
 0x2b3   : > { %v1085_v9 = vpop.xlane.xlu0 %1084 }
 0x2b4   : > { %v1086_v10 = vsub.f32 %v1078_v63, %v1085_v9  ;;  %v1778_v63 = vld [vmem:[%s2807_s15] ss:$0 sm:$0xff] }
 0x2b6   : > { %v1087_v11 = vmul.f32 1.442695, %v1086_v10 }
 0x2b8   : > { %2051 = vpow2.f32 %v1087_v11 }
 0x2c2   : > { %v2052_v13 = vpop.eup %2051 }
 0x2c3   : > { %v1089_v14 = vpack.c.bf16 %v2052_v13, %v2052_v13 }
 0x2c5   : > { %1914 = vmatmul.mubr.bf16.vlgmr.msra.gmra.mrb[0].mxu0 %v1089_v14 }
 0x2c6   : > { %1919 = vmatprep.mubr.msk.bf16.mxu0 %vm2156_vm0, %v2155_v1  ;;  %1918 = vmatpush3.bf16.msra.mxu0 %v1187_v16 }
 0x2c7   : > { %1923 = vmatprep.subr.bf16.mxu0 %v2155_v1 }
 0x398   : > { %v1172_v17 = vpop.f32.mrb[0].mxu0 }
 0x399   : > { %v1178_v18 = vmax.f32 %v1172_v17, 1e-30  ;;  %v1915_v19 = vpop.f32.mrb[1].mxu0 }
 0x39a   : > { %v1175_v12 = vpop.f32.mrb[2].mxu0 }
 0x39b   : > { %2053 = vrcp.f32 %v1178_v18  ;;  %v1916_v20 = vpop.f32.mrb[3].mxu0 }
 0x3a5   : > { %v2054_v21 = vpop.eup %2053 }
 0x3a6   : > { %v1180_v24 = vpack.c.bf16 %v2054_v21, %v2054_v21 }
 0x3a8   : > { %1920 = vmatmul.mubr.msk.bf16.vlgmr.msra.gmra.mrb[4].mxu0 %vm1181_vm3, %v1180_v24 }
 0x3a9   : > { %1924 = vmatpush3.bf16.msra.mxu0 %v1247_v34  ;;  %1939 = vmatprep.mubr.msk.bf16.mxu0 %vm2156_vm0, %v2155_v1 }
 0x3aa   : > { %1925 = vmatprep.subr.bf16.mxu0 %v2155_v1 }
 0x3ad   : > { %1926 = vmatpush3.bf16.msra.mxu0 %v1248_v41 }
 0x3ae   : > { %1927 = vmatprep.subr.bf16.mxu0 %v2155_v1 }
 0x3b1   : > { %1928 = vmatpush3.bf16.msra.mxu0 %v1249_v42 }
 0x3b2   : > { %1929 = vmatprep.subr.bf16.mxu0 %v2155_v1 }
 0x3b5   : > { %1930 = vmatpush3.bf16.msra.mxu0 %v1250_v48 }
 0x3b6   : > { %1931 = vmatprep.subr.bf16.mxu0 %v2155_v1 }
 0x3b9   : > { %1932 = vmatpush3.bf16.msra.mxu0 %v1251_v53  ;;  %v2045_v53 = vld [vmem:[%s2804_s12 + $0x10] sm:$0xff]  }
 0x3ba   : > { %1933 = vmatprep.subr.bf16.mxu0 %v2155_v1 }
 0x3bd   : > { %1934 = vmatpush3.bf16.msra.mxu0 %v1252_v56  ;;  %v2048_v56 = vld [vmem:[%s2804_s12 + $0x28] sm:$0xff]  }
 0x3be   : > { %1935 = vmatprep.subr.bf16.mxu0 %v2155_v1 }
 0x3c1   : > { %1936 = vmatpush3.bf16.msra.mxu0 %v1253_v57 }
 0x3c2   : > { %1937 = vmatprep.subr.bf16.mxu0 %v2155_v1 }
 0x3c5   : > { %1938 = vmatpush3.bf16.msra.mxu0 %v1254_v58 }
 0x3c6   : > { %1959 = vmatprep.subr.bf16.mxu0 %v2155_v1 }
 0x47b   : > { %v1223_v22 = vpop.f32.mrb[4].mxu0 }
 0x47c   : > { %v1229_v23 = vmul.f32 %v2052_v13, %v1223_v22  ;;  %v1921_v25 = vpop.f32.mrb[5].mxu0 }
 0x47d   : > { %v1226_v26 = vpop.f32.mrb[6].mxu0 }
 0x47e   : > { %1230 = vst [vmem:[%s2632_s1] sm:$0xff] %v1229_v23  ;;  %v1255_v27 = vpack.c.bf16 %v1229_v23, %v1229_v23  ;;  %v1922_v28 = vpop.f32.mrb[7].mxu0 }
 0x480   : > { %1940 = vmatmul.mubr.bf16.vlgmr.msra.gmra.mrb[8].mxu0 %v1255_v27 }
 0x481   : > { %1975 = vmatprep.mubr.msk.bf16.mxu0 %vm2156_vm0, %v2155_v1 }
 0x553   : > { %v1290_v31 = vpop.f32.mrb[8].mxu0 }
 0x554   : > { %1296 = vst.msk [vmem:[#allocation2] sm:$0xff] %vm768_vm1, %v1290_v31  ;;  %v1941_v32 = vpop.f32.mrb[9].mxu0 }
 0x555   : > { %v1293_v33 = vpop.f32.mrb[10].mxu0 }
 0x556   : > { %v1942_v34 = vpop.f32.mrb[11].mxu0 }
 0x55b   : > { %v1297_v35 = vld [vmem:[#allocation2] sm:$0xff] }
 0x55c   : > { %v1298_v36 = vpack.c.bf16 %v1297_v35, %v1297_v35 }
 0x55e   : > { %1948 = vmatmul.mubr.msk.bf16.vlgmr.msra.gmra.mrb[16].mxu1 %vm768_vm1, %v1298_v36 }
 0x55f   : > { %1955 = vmatprep.mubr.msk.bf16.mxu1 %vm2156_vm0, %v2155_v1  ;;  %1952 = vmatpush3.bf16.msra.mxu1 %v2041_v50 }
 0x560   : > { %1953 = vmatprep.subr.bf16.mxu1 %v2155_v1 }
 0x563   : > { %1954 = vmatpush3.bf16.msra.mxu1 %v2042_v51 }
 0x631   : > { %v1359_v38 = vpop.f32.mrb[16].mxu1 }
 0x632   : > { %v1360_v39 = vadd.f32 %v1773_v37, %v1359_v38  ;;  %v1949_v40 = vpop.f32.mrb[17].mxu1 }
 0x633   : > { %v1362_v41 = vpop.f32.mrb[18].mxu1 }
 0x634   : > { %v1950_v42 = vpop.f32.mrb[19].mxu1  ;;  %v1365_v43 = vadd.f32 %v1360_v39, %v2350_v4  ;;  %v2043_v4 = vld [vmem:[%s2804_s12] sm:$0xff]  }
 0x635   : > { %1960 = vmatpush3.bf16.msra.mxu0 %v2043_v4 }
 0x636   : > { %v1368_v44 = vsel %vm768_vm1, %v1365_v43, 0.0  ;;  %1961 = vmatprep.subr.bf16.mxu0 %v2155_v1 }
 0x637   : > { %1369 = vadd.xlane.f32.xlu0 %v1368_v44 }
 0x639   : > { %1962 = vmatpush3.bf16.msra.mxu0 %v2044_v52 }
 0x63a   : > { %1963 = vmatprep.subr.bf16.mxu0 %v2155_v1 }
 0x63d   : > { %1964 = vmatpush3.bf16.msra.mxu0 %v2045_v53 }
 0x63e   : > { %1965 = vmatprep.subr.bf16.mxu0 %v2155_v1 }
 0x641   : > { %1966 = vmatpush3.bf16.msra.mxu0 %v2046_v54 }
 0x642   : > { %1967 = vmatprep.subr.bf16.mxu0 %v2155_v1 }
 0x645   : > { %1968 = vmatpush3.bf16.msra.mxu0 %v2047_v55 }
 0x646   : > { %1969 = vmatprep.subr.bf16.mxu0 %v2155_v1 }
 0x649   : > { %1970 = vmatpush3.bf16.msra.mxu0 %v2048_v56 }
 0x64a   : > { %1971 = vmatprep.subr.bf16.mxu0 %v2155_v1 }
 0x64d   : > { %1972 = vmatpush3.bf16.msra.mxu0 %v2049_v5 }
 0x64e   : > { %1973 = vmatprep.subr.bf16.mxu0 %v2155_v1  ;;  %v1783_v1 = vld [vmem:[%s2805_s13] ss:$0 sm:$0xff] }
 0x651   : > { %1974 = vmatpush3.bf16.msra.mxu0 %v2050_v6 }
 0x6c4   : > { %v1370_v45 = vpop.xlane.xlu0 %1369 }
 0x6c5   : > { %v1372_v46 = vmul.f32 0.03125, %v1370_v45 }
 0x6c7   : > { %v1373_v47 = vsub.f32 %v1365_v43, %v1372_v46 }
 0x6c9   : > { %v1374_v48 = vmul.f32 %v1373_v47, %v1373_v47 }
 0x6cb   : > { %v1375_v49 = vsel %vm768_vm1, %v1374_v48, 0.0 }
 0x6cc   : > { %1376 = vadd.xlane.f32.xlu1 %v1375_v49 }
 0x759   : > { %v1377_v57 = vpop.xlane.xlu1 %1376 }
 0x75a   : > { %v1378_v58 = vmul.f32 0.03125, %v1377_v57 }
 0x75c   : > { %v1379_v59 = vadd.f32 1e-05, %v1378_v58 }
 0x75e   : > { %2055 = vrsqrt.f32 %v1379_v59 }
 0x768   : > { %v2056_v60 = vpop.eup %2055 }
 0x769   : > { %v1381_v62 = vmul.f32 %v2056_v60, %v1373_v47 }
 0x76b   : > { %v1388_v0 = vmul.f32 %v1777_v61, %v1381_v62 }
 0x76d   : > { %v1395_v2 = vadd.f32 %v1778_v63, %v1388_v0 }
 0x76f   : > { %v1396_v3 = vpack.c.bf16 %v1395_v2, %v1395_v2 }
 0x771   : > { %1956 = vmatmul.mubr.msk.bf16.vlgmr.msra.gmra.mrb[20].mxu1 %vm768_vm1, %v1396_v3 }
 0x844   : > { %v1457_v8 = vpop.f32.mrb[20].mxu1 }
 0x845   : > { %v1458_v9 = vadd.f32 %v1779_v7, %v1457_v8  ;;  %v1957_v10 = vpop.f32.mrb[21].mxu1 }
 0x846   : > { %v1460_v11 = vpop.f32.mrb[22].mxu1 }
 0x847   : > { %v1463_v13 = vmax.f32 %v1458_v9, 0.0  ;;  %v1958_v14 = vpop.f32.mrb[23].mxu1 }
 0x849   : > { %v1464_v15 = vpack.c.bf16 %v1463_v13, %v1463_v13 }
 0x84b   : > { %1976 = vmatmul.mubr.bf16.vlgmr.msra.gmra.mrb[12].mxu0 %v1464_v15 }
 0x91e   : > { %v1570_v16 = vpop.f32.mrb[12].mxu0 }
 0x91f   : > { %v1571_v17 = vadd.f32 %v1783_v1, %v1570_v16  ;;  %v1977_v18 = vpop.f32.mrb[13].mxu0 }
 0x920   : > { %v1573_v19 = vpop.f32.mrb[14].mxu0 }
 0x921   : > { %v1978_v12 = vpop.f32.mrb[15].mxu0  ;;  %v1576_v20 = vadd.f32 %v1571_v17, %v1395_v2 }
 0x923   : > { %v1579_v21 = vsel %vm768_vm1, %v1576_v20, 0.0 }
 0x924   : > { %1580 = vadd.xlane.f32.xlu1 %v1579_v21 }
 0x9b1   : > { %v1581_v24 = vpop.xlane.xlu1 %1580 }
 0x9b2   : > { %v1582_v22 = vmul.f32 0.03125, %v1581_v24 }
 0x9b4   : > { %v1583_v23 = vsub.f32 %v1576_v20, %v1582_v22 }
 0x9b6   : > { %v1584_v25 = vmul.f32 %v1583_v23, %v1583_v23 }
 0x9b8   : > { %v1585_v26 = vsel %vm768_vm1, %v1584_v25, 0.0 }
 0x9b9   : > { %1586 = vadd.xlane.f32.xlu0 %v1585_v26 }
 0x9ba   : > { %2072 = shalt.err (!%p2069_p4)
}
 0x9bb   : > { %s2073_s1 = scalar_lea.hbm %s2714_s28, 128  ;;  %s2077_s29 = scalar_lea.hbm %s2815_s23, 256 }
 0x9bc   : > { %p2074_p7 = scmp.ne.s32.totalorder %s2714_s28, %s2073_s1  ;;  %p2078_p10 = scmp.lt.u32.totalorder %s2714_s28, %s2815_s23 }
 0x9bd   : > { %p2079_p11 = scmp.lt.u32.totalorder %s2077_s29, %s2073_s1  ;;  %p2081_p13 = scmp.lt.u32.totalorder %s2073_s1, %s2714_s28 }
 0x9be   : > { %p2075_p8 = pnand %p2074_p7, %p2317_p5 }
 0x9bf   : > { %p2080_p12 = por %p2079_p11, %p2078_p10 }
 0x9c0   : > { %p2076_p9 = pneg %p2075_p8 }
 0x9c1   : > { %p2082_p0 = por %p2081_p13, %p2080_p12 }
 0x9c3   : > { %p2083_p1 = pnand %p2082_p0, %p2076_p9 }
 0x9c5   : > { %2086 = shalt.err (!%p2083_p1)
}
 0x9c6   : > { %1980 = dma.vmem_to_hbm [thread:$0]  (%p2317_p5), %s1640_s6, 128, %s2714_s28, %s1613_s3   ;;  %v1792_v31 = vld [vmem:[%s2808_s16] ss:$0 sm:$0xff] }
 0x9c7   : > { %v1793_v33 = vld [vmem:[%s2809_s17] ss:$0 sm:$0xff]  ;;  %s2859_s0 = sshll.u32 %s2627_s4, 3  ;;  %s2860_s28 = sshll.u32 %s2300_s5, 7 }
 0x9c8   : > { %s721_s26 = scalar_lea.vmem [#allocation3], %s2859_s0  ;;  %s2861_s24 = sld [smem:[#allocation25_spill]] }
 0x9c9   : > { %s1626_s29 = sshll.u32 %s721_s26, 4  ;;  %s1608_s25 = scalar_lea.sflag [#allocation4], %s2627_s4  ;;  %s2750_s29 = int_to_ptr.vmem [resolvable:$true] %s1626_s29 }
 0x9ca   : > { %s2087_s27 = scalar_lea.vmem %s2750_s29, 128  ;;  %s2158_s2 = smov [#allocation3]  }
 0x9cb   : > { %p2088_p2 = scmp.ne.s32.totalorder %s2750_s29, %s2087_s27  ;;  %s2091_s5 = sshll.u32 %s2158_s2, 4  ;;  %s2092_s5 = int_to_ptr.vmem [resolvable:$false] %s2091_s5 }
 0x9cc   : > { %s2093_s1 = scalar_lea.vmem %s2092_s5, 256  ;;  %p2094_p7 = scmp.lt.s32.totalorder %s2750_s29, %s2092_s5 }
 0x9cd   : > { %p2089_p3 = pnand %p2088_p2, %p2317_p5  ;;  %p2095_p8 = scmp.lt.s32.totalorder %s2093_s1, %s2087_s27 }
 0x9ce   : > { %s2862_s8 = smov %s2861_s24  ;;  %s2748_s9 = scalar_lea.hbm %s2861_s24, %s2860_s28 }
 0x9cf   : > { %p2090_p4 = pneg %p2089_p3  ;;  %p2096_p9 = por %p2095_p8, %p2094_p7 }
 0x9d1   : > { %p2097_p10 = pnand %p2096_p9, %p2090_p4 }
 0xa46   : > { %v1587_v27 = vpop.xlane.xlu0 %1586 }
 0xa47   : > { %v1588_v28 = vmul.f32 0.03125, %v1587_v27 }
 0xa49   : > { %v1589_v29 = vadd.f32 1e-05, %v1588_v28 }
 0xa4b   : > { %2057 = vrsqrt.f32 %v1589_v29 }
 0xa55   : > { %v2058_v30 = vpop.eup %2057 }
 0xa56   : > { %v1591_v32 = vmul.f32 %v2058_v30, %v1583_v23 }
 0xa58   : > { %v1598_v34 = vmul.f32 %v1792_v31, %v1591_v32 }
 0xa5a   : > { %v1605_v35 = vadd.f32 %v1793_v33, %v1598_v34 }
 0xa5c   : > { %1606 = vst.msk [vmem:[%s721_s26] sm:$0xff] %vm768_vm1, %v1605_v35 }
 0xa5d   : > { %2100 = shalt.err (!%p2097_p10)
}
 0xa5e   : > { %s2101_s4 = scalar_lea.hbm %s2748_s9, 128  ;;  %s2105_s28 = scalar_lea.hbm %s2862_s8, 256 }
 0xa5f   : > { %p2102_p11 = scmp.ne.s32.totalorder %s2748_s9, %s2101_s4  ;;  %p2106_p0 = scmp.lt.u32.totalorder %s2748_s9, %s2862_s8 }
 0xa60   : > { %p2107_p1 = scmp.lt.u32.totalorder %s2105_s28, %s2101_s4  ;;  %p2109_p3 = scmp.lt.u32.totalorder %s2101_s4, %s2748_s9 }
 0xa61   : > { %p2103_p12 = pnand %p2102_p11, %p2317_p5 }
 0xa62   : > { %p2108_p2 = por %p2107_p1, %p2106_p0 }
 0xa63   : > { %p2104_p13 = pneg %p2103_p12 }
 0xa64   : > { %p2110_p4 = por %p2109_p3, %p2108_p2 }
 0xa66   : > { %p2111_p7 = pnand %p2110_p4, %p2104_p13 }
 0xa68   : > { %2114 = shalt.err (!%p2111_p7)
}
 0xa69   : > { %1979 = dma.vmem_to_hbm [thread:$0]  (%p2317_p5), %s2750_s29, 128, %s2748_s9, %s1608_s25  }
 0xa6a PF: > { %s2863_s24 = sld [smem:[#allocation11_spill]]  ;;  %s2864_s27 = sld [smem:[#allocation9_spill]] }
 0xa70   : > { %p1990_p8 = scmp.ge.s32.totalorder %s2863_s24, 2  ;;  %s1651_s5 = sand.u32 1, %s2864_s27  }
 0xa71   : > { %s1652_s1 = scalar_lea.sflag [#allocation4], %s1651_s5 }
 0xa72   : > { %p1984_p9 = pnand %p1990_p8, %p2321_p6 }
 0xa74   : > { %2132 = dma.done.wait (!%p1984_p9), %s1652_s1, 128  }
 0xa75   : > { %2134 = vsyncadd (!%p1984_p9), %s1652_s1, 4294967168  ;;  %s1661_s4 = scalar_lea.sflag [#allocation6], %s1651_s5 }
 0xa76   : > { %2136 = dma.done.wait (!%p1984_p9), %s1661_s4, 128  }
 0xa77   : > { %2138 = vsyncadd (!%p1984_p9), %s1661_s4, 4294967168  ;;  %s2866_s25 = sld [smem:[#allocation12_spill]]  ;;  %s2867_s7 = sld [smem:[#allocation10_spill]] }
 0xa78   : > { %s2868_s24 = sld [smem:[#allocation13_spill]]  ;;  %s2869_s4 = smov %s2145_s30 }
 0xa7d   : > { %p37_p5 = scmp.ge.s32.totalorder %s2866_s25, 4   ;;  %s2870_s30 = smov %s2867_s7 }
 0xa7f   :  { %39 = sbr.rel (!%p37_p5) target bundleno = 17 (0x11), region = 163 }
 0xa86   :  { %1666 = vsyncpa [#allocation4], 1 }
 0xa87   :  { %1668 = vsyncpa [#allocation4 + $0x1], 1 }
 0xa88   :  { %1669 = vsyncpa [#allocation6], 1 }
 0xa89   :  { %1671 = vsyncpa [#allocation6 + $0x1], 1 }

// kernel: tpu_custom_call.1
= control target key start
LH: loop header
LB: loop body
LE: loop exit
PB: predicated region body
PF: predicated region fallthrough
CT: control target
= control target key end

     0   :  { %s2792_s0 = inlined_call_operand.vmem [shape: f32[16,32], index: 0, kind: input, shape index: {}]   ;;  %s2793_s1 = inlined_call_operand.vmem [shape: f32[32,32], index: 1, kind: input, shape index: {}]   ;;  %s2794_s2 = inlined_call_operand.vmem [shape: bf16[32,32], index: 2, kind: input, shape index: {}]   ;;  %s2795_s3 = inlined_call_operand.vmem [shape: f32[1,32], index: 3, kind: input, shape index: {}]   ;;  %s2796_s4 = inlined_call_operand.vmem [shape: bf16[32,32], index: 4, kind: input, shape index: {}]   ;;  %s2797_s5 = inlined_call_operand.vmem [shape: f32[1,32], index: 5, kind: input, shape index: {}]   ;;  %s2798_s6 = inlined_call_operand.vmem [shape: bf16[32,32], index: 6, kind: input, shape index: {}]   ;;  %s2799_s7 = inlined_call_operand.vmem [shape: f32[1,32], index: 7, kind: input, shape index: {}]   ;;  %s2800_s8 = inlined_call_operand.vmem [shape: bf16[32,32], index: 8, kind: input, shape index: {}]   ;;  %s2801_s9 = inlined_call_operand.vmem [shape: f32[1,32], index: 9, kind: input, shape index: {}]   ;;  %s2802_s10 = inlined_call_operand.vmem [shape: bf16[32,128], index: 10, kind: input, shape index: {}]   ;;  %s2803_s11 = inlined_call_operand.vmem [shape: f32[1,128], index: 11, kind: input, shape index: {}]   ;;  %s2804_s12 = inlined_call_operand.vmem [shape: bf16[128,32], index: 12, kind: input, shape index: {}]   ;;  %s2805_s13 = inlined_call_operand.vmem [shape: f32[1,32], index: 13, kind: input, shape index: {}]   ;;  %s2806_s14 = inlined_call_operand.vmem [shape: f32[1,32], index: 14, kind: input, shape index: {}]   ;;  %s2807_s15 = inlined_call_operand.vmem [shape: f32[1,32], index: 15, kind: input, shape index: {}]   ;;  %s2808_s16 = inlined_call_operand.vmem [shape: f32[1,32], index: 16, kind: input, shape index: {}]   ;;  %s2809_s17 = inlined_call_operand.vmem [shape: f32[1,32], index: 17, kind: input, shape index: {}]   ;;  %s2810_s18 = inlined_call_operand.vmem [shape: f32[128,32], index: 18, kind: input, shape index: {}]   ;;  %s2811_s19 = inlined_call_operand.vmem [shape: f32[128,32], index: 19, kind: input, shape index: {}]   ;;  %s2812_s20 = inlined_call_operand.vmem [shape: bf16[128,8], index: 20, kind: input, shape index: {}]   ;;  %s2813_s21 = inlined_call_operand.vmem [shape: bf16[8,128], index: 21, kind: input, shape index: {}]   ;;  %s2814_s22 = inlined_call_operand.hbm [shape: f32[16,32], index: 22, kind: output, shape index: {0}]   ;;  %s2815_s23 = inlined_call_operand.hbm [shape: f32[16,128], index: 23, kind: output, shape index: {1}]  }
   0x1   :  { %2830 = sst [smem:[#allocation15_spill]] %s2792_s0 }
   0x2   :  { %2831 = sst [smem:[#allocation16_spill]] %s2793_s1 }
   0x3   :  { %2832 = sst [smem:[#allocation17_spill]] %s2794_s2 }
   0x4   :  { %2833 = sst [smem:[#allocation18_spill]] %s2795_s3 }
   0x5   :  { %2834 = sst [smem:[#allocation19_spill]] %s2796_s4 }
   0x6   :  { %2835 = sst [smem:[#allocation20_spill]] %s2797_s5 }
   0x7   :  { %2836 = sst [smem:[#allocation21_spill]] %s2798_s6 }
   0x8   :  { %2837 = sst [smem:[#allocation22_spill]] %s2799_s7 }
   0x9   :  { %2838 = sst [smem:[#allocation23_spill]] %s2800_s8 }
   0xa   :  { %2839 = sst [smem:[#allocation24_spill]] %s2801_s9 }
   0xb   :  { %2840 = sst [smem:[#allocation25_spill]] %s2814_s22 }
   0xc   :  { %29 = vsyncpa [#allocation4], 0 }
   0xd   :  { %31 = vsyncpa [#allocation4 + $0x1], 0 }
   0xe   :  { %32 = vsyncpa [#allocation6], 0 }
   0xf   :  { %34 = vsyncpa [#allocation6 + $0x1], 0  ;;  %s2279_s4 = smov 0   ;;  %s2281_s30 = smov 0  }
  0x10   :  { %s2283_s24 = smov 0   ;;  %s2285_s25 = smov 0  }
  0x11 LB: > { %2841 = sst [smem:[#allocation9_spill]] %s2141_s4  ;;  %s2300_s5 = sadd.s32 4294967295, %s2153_s25   ;;  %s2153_s25 = sphi %s2285_s25, %s2866_s25   ;;  %s2149_s24 = sphi %s2283_s24, %s2868_s24   ;;  %s2145_s30 = sphi %s2281_s30, %s2870_s30   ;;  %s2141_s4 = sphi %s2279_s4, %s2869_s4  }
  0x12   : > { %2842 = sst [smem:[#allocation10_spill]] %s2149_s24  ;;  %s1742_s1 = sadd.s32 4294967294, %s2153_s25  }
  0x13   : > { %2843 = sst [smem:[#allocation11_spill]] %s2153_s25  ;;  %s2304_s26 = sadd.s32 1, %s2153_s25  }
  0x14   : > { %2844 = sst [smem:[#allocation12_spill]] %s2304_s26  ;;  %s519_s2 = sadd.s32 1, %s2149_s24 }
  0x15   : > { %s516_s6 = ssub.s32 %s2153_s25, %s2304_s26  ;;  %p529_p0 = scmp.ne.s32.totalorder %s2149_s24, %s2145_s30 }
  0x16   : > { %p517_p1 = scmp.eq.s32.totalorder %s516_s6, 0  ;;  %p530_p2 = scmp.eq.s32.totalorder %s2300_s5, 1 }
  0x17   : > { %p535_p3 = scmp.ne.s32.totalorder %s2145_s30, %s2141_s4  ;;  %p536_p4 = scmp.eq.s32.totalorder %s1742_s1, 1 }
  0x18   : > { %s2315_s27 = scalar_select %p517_p1, %s2149_s24, %s519_s2  }
  0x19   : > { %p2317_p5 = por %p530_p2, %p529_p0  ;;  %p2321_p6 = por %p536_p4, %p535_p3 }
  0x1a   : > { %2845 = sst [smem:[#allocation13_spill]] %s2315_s27  ;;  %p1745_p7 = scmp.ge.s32.totalorder %s2153_s25, 1 }
  0x1b   : > { %s2847_s28 = scalar_select %p2321_p6, 1, 0 }
  0x1c   : > { %p656_p8 = scmp.lt.s32.totalorder %s2153_s25, 3 }
  0x1d   : > { %2848 = sst [smem:[#allocation14_spill]] %s2847_s28 }
  0x1e   : > { %p657_p9 = pnand %p1745_p7, %p656_p8 }
  0x1f   : > { %s2849_s0 = sld [smem:[#allocation17_spill]] (!%p657_p9)  ;;  %v2155_v1 = vmov (!%p657_p9), 0.0   ;;  %vm2156_vm0 = vmmov (!%p657_p9), 0   ;;  %p729_p10 = scmp.lt.s32.totalorder (!%p657_p9), %s2300_s5, 1  ;;  %vm768_vm1 = vcmask (!%p657_p9), 261120   ;;  %v943_v17 = vld [vmem:[%s2810_s18] sm:$0xff] (!%p657_p9) }
  0x20   : > { %660 = sbr.rel (%p657_p9) target bundleno = 2666 (0xa6a), region = 108  ;;  %1853 = vmatprep.subr.bf16.mxu1 (!%p657_p9), %v2155_v1  ;;  %1897 = vmatprep.subr.bf16.mxu0 (!%p657_p9), %v2155_v1  ;;  %s1749_s6 = sshll.u32 (!%p657_p9), %s2300_s5, 1  ;;  %v945_v18 = vld [vmem:[%s2810_s18 + $0x10] sm:$0xff] (!%p657_p9)  ;;  %v947_v19 = vld [vmem:[%s2810_s18 + $0x20] sm:$0xff] (!%p657_p9)  ;;  %v944_v21 = vld [vmem:[%s2810_s18 + $0x8] sm:$0xff] (!%p657_p9)  ;;  %vm1185_vm2 = vcmask (!%p657_p9), 1043456  }
  0x21   : > { %1857 = vmatprep.mubr.msk.bf16.mxu1 (!%p657_p9), %vm2156_vm0, %v2155_v1  ;;  %1913 = vmatprep.mubr.msk.bf16.mxu0 (!%p657_p9), %vm2156_vm0, %v2155_v1  ;;  %p734_p11 = scmp.lt.s32.totalorder (!%p657_p9), %s1749_s6, 3  ;;  %s2850_s1 = sld [smem:[#allocation19_spill]] (!%p657_p9)  ;;  %v949_v22 = vld [vmem:[%s2810_s18 + $0x30] sm:$0xff] (!%p657_p9)  ;;  %v951_v23 = vld [vmem:[%s2810_s18 + $0x40] sm:$0xff] (!%p657_p9)  ;;  %v946_v26 = vld [vmem:[%s2810_s18 + $0x18] sm:$0xff] (!%p657_p9)  ;;  %vm1181_vm3 = vcmask (!%p657_p9), 64512  }
  0x22   : > { %s2851_s26 = sld [smem:[#allocation15_spill]] (!%p657_p9)  ;;  %s2852_s22 = sld [smem:[#allocation16_spill]] (!%p657_p9)  ;;  %v953_v27 = vld [vmem:[%s2810_s18 + $0x50] sm:$0xff] (!%p657_p9)  ;;  %v955_v28 = vld [vmem:[%s2810_s18 + $0x60] sm:$0xff] (!%p657_p9)  ;;  %v948_v30 = vld [vmem:[%s2810_s18 + $0x28] sm:$0xff] (!%p657_p9) }
  0x23   : > { %s2854_s2 = sld [smem:[#allocation20_spill]] (!%p657_p9)  ;;  %v950_v31 = vld [vmem:[%s2810_s18 + $0x38] sm:$0xff] (!%p657_p9)  ;;  %v952_v32 = vld [vmem:[%s2810_s18 + $0x48] sm:$0xff] (!%p657_p9)  ;;  %v957_v40 = vld [vmem:[%s2810_s18 + $0x70] sm:$0xff] (!%p657_p9)  ;;  %s2856_s24 = sld [smem:[#allocation22_spill]] (!%p657_p9) }
  0x24   : > { %v954_v38 = vld [vmem:[%s2810_s18 + $0x58] sm:$0xff] (!%p657_p9)  ;;  %v956_v39 = vld [vmem:[%s2810_s18 + $0x68] sm:$0xff] (!%p657_p9)  ;;  %s2627_s4 = sand.u32 (!%p657_p9), 1, %s2145_s30   ;;  %s2857_s8 = sld [smem:[#allocation23_spill]] (!%p657_p9) }
  0x25   : > { %v2025_v0 = vld [vmem:[%s2849_s0] sm:$0xff] (!%p657_p9)   ;;  %v2026_v2 = vld [vmem:[%s2849_s0 + $0x8] sm:$0xff] (!%p657_p9)   ;;  %v958_v49 = vld [vmem:[%s2810_s18 + $0x78] sm:$0xff] (!%p657_p9)  ;;  %s2828_s25 = sshll.u32 (!%p657_p9), %s2627_s4, 3  ;;  %s2858_s9 = sld [smem:[#allocation24_spill]] (!%p657_p9) }
  0x26   : > { %1854 = vmatpush3.bf16.msra.mxu1 (!%p657_p9), %v2025_v0  ;;  %s2829_s27 = sshll.u32 (!%p657_p9), %s2300_s5, 7 }
  0x27   : > { %1855 = vmatprep.subr.bf16.mxu1 %v2155_v1  ;;  %s730_s29 = scalar_select %p729_p10, %s2300_s5, 1  ;;  %v2027_v3 = vld [vmem:[%s2850_s1] sm:$0xff]   ;;  %v2028_v6 = vld [vmem:[%s2850_s1 + $0x8] sm:$0xff]  }
  0x28   : > { %s2872_s6 = smov (!%p734_p11, %s1749_s6), 3  ;;  %s2632_s1 = scalar_lea.vmem [#allocation5], %s2828_s25 }
  0x29   : > { %s1748_s3 = sshll.u32 %s730_s29, 3  ;;  %s1750_s29 = sshll.u32 %s2872_s6, 3  ;;  %v1755_v16 = vld [vmem:[%s2854_s2] ss:$0 sm:$0xff] }
  0x2a   : > { %1856 = vmatpush3.bf16.msra.mxu1 %v2026_v2  ;;  %s732_s28 = scalar_lea.vmem %s2851_s26, %s1748_s3  ;;  %s737_s0 = scalar_lea.vmem %s2852_s22, %s1750_s29 }
  0x2b   : > { %1861 = vmatprep.subr.bf16.mxu1 %v2155_v1  ;;  %v2350_v4 = vld [vmem:[%s732_s28] sm:$0xff]  ;;  %v742_v8 = vld [vmem:[%s737_s0 + $0x8] sm:$0xff]  ;;  %s2853_s22 = sld [smem:[#allocation21_spill]]  ;;  %s2855_s3 = sld [smem:[#allocation18_spill]] }
  0x2c   : > { %v743_v5 = vpack.c.bf16 %v2350_v4, %v2350_v4  ;;  %v741_v7 = vld [vmem:[%s737_s0] sm:$0xff]  ;;  %s2714_s28 = scalar_lea.hbm %s2815_s23, %s2829_s27  ;;  %s1639_s6 = sshll.u32 %s2632_s1, 4  ;;  %s1640_s6 = int_to_ptr.vmem [resolvable:$true] %s1639_s6 }
  0x2d   : > { %v744_v9 = vpack.c.bf16 %v742_v8, %v741_v7  ;;  %s2059_s2 = scalar_lea.vmem %s1640_s6, 128  ;;  %s2157_s29 = smov [#allocation5]  }
  0x2e   : > { %1858 = vmatmul.mubr.msk.bf16.vlgmr.msra.gmra.mrb[0].mxu1 %vm768_vm1, %v743_v5  ;;  %p2060_p12 = scmp.ne.s32.totalorder %s1640_s6, %s2059_s2 }
  0x2f   : > { %1862 = vmatpush3.bf16.msra.mxu1 %v2027_v3  ;;  %1865 = vmatprep.mubr.msk.bf16.mxu1 %vm2156_vm0, %v2155_v1 }
  0x30   : > { %1863 = vmatprep.subr.bf16.mxu1 %v2155_v1  ;;  %p2061_p13 = pnand %p2060_p12, %p2317_p5 }
  0x31   : > { %v2029_v10 = vld [vmem:[%s2853_s22] sm:$0xff]   ;;  %v2030_v11 = vld [vmem:[%s2853_s22 + $0x8] sm:$0xff]  }
  0x32   : > { %v1751_v8 = vld [vmem:[%s2855_s3] ss:$0 sm:$0xff]  ;;  %s1613_s3 = scalar_lea.sflag [#allocation6], %s2627_s4  ;;  %p2062_p0 = pneg %p2061_p13 }
  0x33   : > { %1864 = vmatpush3.bf16.msra.mxu1 %v2028_v6 }
  0x34   : > { %1869 = vmatprep.subr.bf16.mxu1 %v2155_v1 }
  0x36   : > { %1866 = vmatmul.mubr.msk.bf16.vlgmr.msra.gmra.mrb[4].mxu1 %vm768_vm1, %v744_v9 }
  0x37   : > { %1873 = vmatprep.mubr.msk.bf16.mxu1 %vm2156_vm0, %v2155_v1  ;;  %1870 = vmatpush3.bf16.msra.mxu1 %v2029_v10 }
  0x38   : > { %1871 = vmatprep.subr.bf16.mxu1 %v2155_v1 }
  0x3b   : > { %1872 = vmatpush3.bf16.msra.mxu1 %v2030_v11 }
  0x3c   : > { %1877 = vmatprep.subr.bf16.mxu1 %v2155_v1 }
  0x3e   : > { %1874 = vmatmul.mubr.msk.bf16.vlgmr.msra.gmra.mrb[8].mxu1 %vm768_vm1, %v744_v9 }
  0x3f   : > { %1893 = vmatprep.mubr.msk.bf16.mxu1 %vm2156_vm0, %v2155_v1 }
 0x101   : > { %v2379_v12 = vpop.f32.mrb[0].mxu1 }
 0x102   : > { %v1859_v13 = vpop.f32.mrb[1].mxu1  ;;  %v807_v10 = vadd.f32 %v1751_v8, %v2379_v12  ;;  %v959_v12 = vld [vmem:[%s2811_s19] sm:$0xff]  ;;  %v2038_v8 = vld [vmem:[%s2812_s20 + $0x38] sm:$0xff]  }
 0x103   : > { %v809_v14 = vpop.f32.mrb[2].mxu1 }
 0x104   : > { %v1860_v15 = vpop.f32.mrb[3].mxu1  ;;  %v1016_v11 = vpack.c.bf16 %v807_v10, %v807_v10 }
 0x109   : > { %v872_v20 = vpop.f32.mrb[4].mxu1 }
 0x10a   : > { %v873_v24 = vadd.f32 %v1755_v16, %v872_v20  ;;  %v1867_v25 = vpop.f32.mrb[5].mxu1  ;;  %v960_v20 = vld [vmem:[%s2811_s19 + $0x8] sm:$0xff] }
 0x10b   : > { %v875_v29 = vpop.f32.mrb[6].mxu1 }
 0x10c   : > { %v876_v33 = vadd.f32 %v1755_v16, %v875_v29  ;;  %v1868_v34 = vpop.f32.mrb[7].mxu1  ;;  %v992_v35 = vmul.f32 %v943_v17, %v873_v24  ;;  %v994_v36 = vmul.f32 %v945_v18, %v873_v24  ;;  %v996_v37 = vmul.f32 %v947_v19, %v873_v24  ;;  %v1759_v17 = vld [vmem:[%s2856_s24] ss:$0 sm:$0xff]  ;;  %s2063_s24 = sshll.u32 %s2157_s29, 4  ;;  %s2064_s24 = int_to_ptr.vmem [resolvable:$false] %s2063_s24 }
 0x10d   : > { %v998_v41 = vmul.f32 %v949_v22, %v873_v24  ;;  %v1000_v42 = vmul.f32 %v951_v23, %v873_v24  ;;  %v1002_v43 = vmul.f32 %v953_v27, %v873_v24  ;;  %v1004_v44 = vmul.f32 %v955_v28, %v873_v24  ;;  %v964_v27 = vld [vmem:[%s2811_s19 + $0x28] sm:$0xff]  ;;  %s2065_s25 = scalar_lea.vmem %s2064_s24, 256  ;;  %p2066_p1 = scmp.lt.s32.totalorder %s1640_s6, %s2064_s24 }
 0x10e   : > { %v993_v45 = vmul.f32 %v944_v21, %v876_v33  ;;  %v995_v46 = vmul.f32 %v946_v26, %v876_v33  ;;  %v997_v47 = vmul.f32 %v948_v30, %v876_v33  ;;  %v999_v48 = vmul.f32 %v950_v31, %v876_v33  ;;  %v961_v21 = vld [vmem:[%s2811_s19 + $0x10] sm:$0xff]  ;;  %v963_v26 = vld [vmem:[%s2811_s19 + $0x20] sm:$0xff]  ;;  %p2067_p2 = scmp.lt.s32.totalorder %s2065_s25, %s2059_s2 }
 0x10f   : > { %v1001_v50 = vmul.f32 %v952_v32, %v876_v33  ;;  %v1003_v51 = vmul.f32 %v954_v38, %v876_v33  ;;  %v1005_v52 = vmul.f32 %v956_v39, %v876_v33  ;;  %v1006_v53 = vmul.f32 %v957_v40, %v873_v24  ;;  %v962_v24 = vld [vmem:[%s2811_s19 + $0x18] sm:$0xff]  ;;  %v965_v31 = vld [vmem:[%s2811_s19 + $0x30] sm:$0xff] }
 0x110   : > { %v1008_v54 = vpack.c.bf16 %v993_v45, %v992_v35  ;;  %v1009_v55 = vpack.c.bf16 %v995_v46, %v994_v36  ;;  %v1010_v56 = vpack.c.bf16 %v997_v47, %v996_v37  ;;  %v1011_v57 = vpack.c.bf16 %v999_v48, %v998_v41  ;;  %v966_v32 = vld [vmem:[%s2811_s19 + $0x38] sm:$0xff]  ;;  %v968_v37 = vld [vmem:[%s2811_s19 + $0x48] sm:$0xff]  ;;  %v969_v39 = vld [vmem:[%s2811_s19 + $0x50] sm:$0xff]  ;;  %p2068_p3 = por %p2067_p2, %p2066_p1 }
 0x111   : > { %v1012_v58 = vpack.c.bf16 %v1001_v50, %v1000_v42  ;;  %v1013_v59 = vpack.c.bf16 %v1003_v51, %v1002_v43  ;;  %v1014_v60 = vpack.c.bf16 %v1005_v52, %v1004_v44  ;;  %v1007_v61 = vmul.f32 %v958_v49, %v876_v33  ;;  %v936_v13 = vpop.f32.mrb[8].mxu1  ;;  %v967_v33 = vld [vmem:[%s2811_s19 + $0x40] sm:$0xff]  ;;  %v970_v40 = vld [vmem:[%s2811_s19 + $0x58] sm:$0xff]  ;;  %v972_v46 = vld [vmem:[%s2811_s19 + $0x68] sm:$0xff] }
 0x112   : > { %v1021_v62 = vsel %vm768_vm1, %v1008_v54, 0  ;;  %v1024_v0 = vsel %vm768_vm1, %v1009_v55, 0  ;;  %v1027_v2 = vsel %vm768_vm1, %v1010_v56, 0  ;;  %v1030_v3 = vsel %vm768_vm1, %v1011_v57, 0  ;;  %v1875_v14 = vpop.f32.mrb[9].mxu1  ;;  %v971_v45 = vld [vmem:[%s2811_s19 + $0x60] sm:$0xff]  ;;  %p2069_p4 = pnand %p2068_p3, %p2062_p0 }
 0x113   : > { %1878 = vmatpush3.bf16.xpose.msra.mxu1 %v1021_v62  ;;  %v1015_v63 = vpack.c.bf16 %v1007_v61, %v1006_v53  ;;  %v1033_v5 = vsel %vm768_vm1, %v1012_v58, 0  ;;  %v1036_v6 = vsel %vm768_vm1, %v1013_v59, 0  ;;  %v1039_v7 = vsel %vm768_vm1, %v1014_v60, 0  ;;  %v939_v15 = vpop.f32.mrb[10].mxu1  ;;  %v973_v47 = vld [vmem:[%s2811_s19 + $0x70] sm:$0xff]  ;;  %v974_v52 = vld [vmem:[%s2811_s19 + $0x78] sm:$0xff] }
 0x114   : > { %1879 = vmatprep.subr.bf16.mxu1 %v2155_v1  ;;  %v1876_v16 = vpop.f32.mrb[11].mxu1  ;;  %v937_v18 = vadd.f32 %v1759_v17, %v936_v13  ;;  %v940_v19 = vadd.f32 %v1759_v17, %v939_v15  ;;  %v2031_v59 = vld [vmem:[%s2812_s20] sm:$0xff]   ;;  %v2032_v60 = vld [vmem:[%s2812_s20 + $0x8] sm:$0xff]   ;;  %v2033_v61 = vld [vmem:[%s2812_s20 + $0x10] sm:$0xff]  }
 0x115   : > { %v1042_v9 = vsel %vm768_vm1, %v1015_v63, 0  ;;  %1898 = vmatpush3.bf16.msra.mxu0 %v2031_v59  ;;  %v2034_v62 = vld [vmem:[%s2812_s20 + $0x18] sm:$0xff]   ;;  %v991_v15 = vld [vmem:[%s2813_s21] sm:$0xf] }
 0x116   : > { %v2467_v22 = vmul.f32 %v959_v12, %v937_v18  ;;  %v2469_v23 = vmul.f32 %v960_v20, %v940_v19  ;;  %v2474_v25 = vmul.f32 %v961_v21, %v937_v18  ;;  %v2482_v28 = vmul.f32 %v962_v24, %v940_v19  ;;  %1899 = vmatprep.subr.bf16.mxu0 %v2155_v1 }
 0x117   : > { %v2484_v29 = vmul.f32 %v963_v26, %v937_v18  ;;  %v2486_v30 = vmul.f32 %v964_v27, %v940_v19  ;;  %v2499_v35 = vmul.f32 %v965_v31, %v937_v18  ;;  %v2501_v36 = vmul.f32 %v966_v32, %v940_v19 }
 0x118   : > { %v1247_v34 = vpack.c.bf16 %v2469_v23, %v2467_v22  ;;  %v2506_v38 = vmul.f32 %v967_v33, %v937_v18  ;;  %v1248_v41 = vpack.c.bf16 %v2482_v28, %v2474_v25  ;;  %v2518_v43 = vmul.f32 %v968_v37, %v940_v19  ;;  %v1773_v37 = vld [vmem:[%s2858_s9] ss:$0 sm:$0xff] }
 0x119   : > { %v1249_v42 = vpack.c.bf16 %v2486_v30, %v2484_v29  ;;  %v2520_v44 = vmul.f32 %v969_v39, %v937_v18  ;;  %v1250_v48 = vpack.c.bf16 %v2501_v36, %v2499_v35  ;;  %v2533_v49 = vmul.f32 %v970_v40, %v940_v19  ;;  %1900 = vmatpush3.bf16.msra.mxu0 %v2032_v60  ;;  %v2039_v29 = vld [vmem:[%s2857_s8] sm:$0xff]   ;;  %v2040_v30 = vld [vmem:[%s2857_s8 + $0x8] sm:$0xff]  }
 0x11a   : > { %v2535_v50 = vmul.f32 %v971_v45, %v937_v18  ;;  %v2537_v51 = vmul.f32 %v972_v46, %v940_v19  ;;  %v1251_v53 = vpack.c.bf16 %v2518_v43, %v2506_v38  ;;  %v2544_v54 = vmul.f32 %v973_v47, %v937_v18  ;;  %1901 = vmatprep.subr.bf16.mxu0 %v2155_v1 }
 0x11b   : > { %1880 = vmatpush3.bf16.xpose.msra.mxu1 %v1024_v0  ;;  %v2546_v55 = vmul.f32 %v974_v52, %v940_v19  ;;  %v1252_v56 = vpack.c.bf16 %v2533_v49, %v2520_v44  ;;  %v1187_v16 = vsel %vm1185_vm2, %v991_v15, 0  ;;  %v2044_v52 = vld [vmem:[%s2804_s12 + $0x8] sm:$0xff]  }
 0x11c   : > { %1881 = vmatprep.subr.bf16.mxu1 %v2155_v1  ;;  %v1253_v57 = vpack.c.bf16 %v2537_v51, %v2535_v50  ;;  %v2041_v50 = vld [vmem:[%s2802_s10] sm:$0xff]   ;;  %v2042_v51 = vld [vmem:[%s2802_s10 + $0x8] sm:$0xff]  }
 0x11d   : > { %v1254_v58 = vpack.c.bf16 %v2546_v55, %v2544_v54  ;;  %1902 = vmatpush3.bf16.msra.mxu0 %v2033_v61  ;;  %v2046_v54 = vld [vmem:[%s2804_s12 + $0x18] sm:$0xff]   ;;  %v2047_v55 = vld [vmem:[%s2804_s12 + $0x20] sm:$0xff]  }
 0x11e   : > { %1903 = vmatprep.subr.bf16.mxu0 %v2155_v1  ;;  %v1777_v61 = vld [vmem:[%s2806_s14] ss:$0 sm:$0xff] }
 0x121   : > { %1904 = vmatpush3.bf16.msra.mxu0 %v2034_v62 }
 0x122   : > { %1905 = vmatprep.subr.bf16.mxu0 %v2155_v1 }
 0x123   : > { %1882 = vmatpush3.bf16.xpose.msra.mxu1 %v1027_v2 }
 0x124   : > { %1883 = vmatprep.subr.bf16.mxu1 %v2155_v1 }
 0x12b   : > { %1884 = vmatpush3.bf16.xpose.msra.mxu1 %v1030_v3 }
 0x12c   : > { %1885 = vmatprep.subr.bf16.mxu1 %v2155_v1 }
 0x133   : > { %1886 = vmatpush3.bf16.xpose.msra.mxu1 %v1033_v5  ;;  %v2035_v5 = vld [vmem:[%s2812_s20 + $0x20] sm:$0xff]  }
 0x134   : > { %1887 = vmatprep.subr.bf16.mxu1 %v2155_v1  ;;  %1906 = vmatpush3.bf16.msra.mxu0 %v2035_v5  ;;  %v2049_v5 = vld [vmem:[%s2804_s12 + $0x30] sm:$0xff]  }
 0x135   : > { %1907 = vmatprep.subr.bf16.mxu0 %v2155_v1 }
 0x13b   : > { %1888 = vmatpush3.bf16.xpose.msra.mxu1 %v1036_v6  ;;  %v2036_v6 = vld [vmem:[%s2812_s20 + $0x28] sm:$0xff]  }
 0x13c   : > { %1889 = vmatprep.subr.bf16.mxu1 %v2155_v1  ;;  %1908 = vmatpush3.bf16.msra.mxu0 %v2036_v6  ;;  %v2050_v6 = vld [vmem:[%s2804_s12 + $0x38] sm:$0xff]  }
 0x13d   : > { %1909 = vmatprep.subr.bf16.mxu0 %v2155_v1 }
 0x143   : > { %1890 = vmatpush3.bf16.xpose.msra.mxu1 %v1039_v7  ;;  %v2037_v7 = vld [vmem:[%s2812_s20 + $0x30] sm:$0xff]  }
 0x144   : > { %1891 = vmatprep.subr.bf16.mxu1 %v2155_v1  ;;  %1910 = vmatpush3.bf16.msra.mxu0 %v2037_v7  ;;  %v1779_v7 = vld [vmem:[%s2803_s11] ss:$0 sm:$0xff] }
 0x145   : > { %1911 = vmatprep.subr.bf16.mxu0 %v2155_v1 }
 0x148   : > { %1912 = vmatpush3.bf16.msra.mxu0 %v2038_v8 }
 0x149   : > { %1917 = vmatprep.subr.bf16.mxu0 %v2155_v1 }
 0x14b   : > { %1892 = vmatpush3.bf16.xpose.msra.mxu1 %v1042_v9 }
 0x14c   : > { %1943 = vmatprep.subr.bf16.mxu1 %v2155_v1 }
 0x152   : > { %1894 = vmatmul.mubr.msk.bf16.vlgmr.msra.gmra.mrb[12].mxu1 %vm768_vm1, %v1016_v11 }
 0x153   : > { %1947 = vmatprep.mubr.msk.bf16.mxu1 %vm2156_vm0, %v2155_v1  ;;  %1944 = vmatpush3.bf16.msra.mxu1 %v2039_v29 }
 0x154   : > { %1945 = vmatprep.subr.bf16.mxu1 %v2155_v1 }
 0x157   : > { %1946 = vmatpush3.bf16.msra.mxu1 %v2040_v30 }
 0x158   : > { %1951 = vmatprep.subr.bf16.mxu1 %v2155_v1 }
 0x225   : > { %v1078_v63 = vpop.f32.mrb[12].mxu1 }
 0x226   : > { %1084 = vmax.xlane.f32.xlu0 %v1078_v63  ;;  %v1895_v0 = vpop.f32.mrb[13].mxu1 }
 0x227   : > { %v1081_v2 = vpop.f32.mrb[14].mxu1 }
 0x228   : > { %v1896_v3 = vpop.f32.mrb[15].mxu1 }
 0x2b3   : > { %v1085_v9 = vpop.xlane.xlu0 %1084 }
 0x2b4   : > { %v1086_v10 = vsub.f32 %v1078_v63, %v1085_v9  ;;  %v1778_v63 = vld [vmem:[%s2807_s15] ss:$0 sm:$0xff] }
 0x2b6   : > { %v1087_v11 = vmul.f32 1.442695, %v1086_v10 }
 0x2b8   : > { %2051 = vpow2.f32 %v1087_v11 }
 0x2c2   : > { %v2052_v13 = vpop.eup %2051 }
 0x2c3   : > { %v1089_v14 = vpack.c.bf16 %v2052_v13, %v2052_v13 }
 0x2c5   : > { %1914 = vmatmul.mubr.bf16.vlgmr.msra.gmra.mrb[0].mxu0 %v1089_v14 }
 0x2c6   : > { %1919 = vmatprep.mubr.msk.bf16.mxu0 %vm2156_vm0, %v2155_v1  ;;  %1918 = vmatpush3.bf16.msra.mxu0 %v1187_v16 }
 0x2c7   : > { %1923 = vmatprep.subr.bf16.mxu0 %v2155_v1 }
 0x398   : > { %v1172_v17 = vpop.f32.mrb[0].mxu0 }
 0x399   : > { %v1178_v18 = vmax.f32 %v1172_v17, 1e-30  ;;  %v1915_v19 = vpop.f32.mrb[1].mxu0 }
 0x39a   : > { %v1175_v12 = vpop.f32.mrb[2].mxu0 }
 0x39b   : > { %2053 = vrcp.f32 %v1178_v18  ;;  %v1916_v20 = vpop.f32.mrb[3].mxu0 }
 0x3a5   : > { %v2054_v21 = vpop.eup %2053 }
 0x3a6   : > { %v1180_v24 = vpack.c.bf16 %v2054_v21, %v2054_v21 }
 0x3a8   : > { %1920 = vmatmul.mubr.msk.bf16.vlgmr.msra.gmra.mrb[4].mxu0 %vm1181_vm3, %v1180_v24 }
 0x3a9   : > { %1924 = vmatpush3.bf16.msra.mxu0 %v1247_v34  ;;  %1939 = vmatprep.mubr.msk.bf16.mxu0 %vm2156_vm0, %v2155_v1 }
 0x3aa   : > { %1925 = vmatprep.subr.bf16.mxu0 %v2155_v1 }
 0x3ad   : > { %1926 = vmatpush3.bf16.msra.mxu0 %v1248_v41 }
 0x3ae   : > { %1927 = vmatprep.subr.bf16.mxu0 %v2155_v1 }
 0x3b1   : > { %1928 = vmatpush3.bf16.msra.mxu0 %v1249_v42 }
 0x3b2   : > { %1929 = vmatprep.subr.bf16.mxu0 %v2155_v1 }
 0x3b5   : > { %1930 = vmatpush3.bf16.msra.mxu0 %v1250_v48 }
 0x3b6   : > { %1931 = vmatprep.subr.bf16.mxu0 %v2155_v1 }
 0x3b9   : > { %1932 = vmatpush3.bf16.msra.mxu0 %v1251_v53  ;;  %v2045_v53 = vld [vmem:[%s2804_s12 + $0x10] sm:$0xff]  }
 0x3ba   : > { %1933 = vmatprep.subr.bf16.mxu0 %v2155_v1 }
 0x3bd   : > { %1934 = vmatpush3.bf16.msra.mxu0 %v1252_v56  ;;  %v2048_v56 = vld [vmem:[%s2804_s12 + $0x28] sm:$0xff]  }
 0x3be   : > { %1935 = vmatprep.subr.bf16.mxu0 %v2155_v1 }
 0x3c1   : > { %1936 = vmatpush3.bf16.msra.mxu0 %v1253_v57 }
 0x3c2   : > { %1937 = vmatprep.subr.bf16.mxu0 %v2155_v1 }
 0x3c5   : > { %1938 = vmatpush3.bf16.msra.mxu0 %v1254_v58 }
 0x3c6   : > { %1959 = vmatprep.subr.bf16.mxu0 %v2155_v1 }
 0x47b   : > { %v1223_v22 = vpop.f32.mrb[4].mxu0 }
 0x47c   : > { %v1229_v23 = vmul.f32 %v2052_v13, %v1223_v22  ;;  %v1921_v25 = vpop.f32.mrb[5].mxu0 }
 0x47d   : > { %v1226_v26 = vpop.f32.mrb[6].mxu0 }
 0x47e   : > { %1230 = vst [vmem:[%s2632_s1] sm:$0xff] %v1229_v23  ;;  %v1255_v27 = vpack.c.bf16 %v1229_v23, %v1229_v23  ;;  %v1922_v28 = vpop.f32.mrb[7].mxu0 }
 0x480   : > { %1940 = vmatmul.mubr.bf16.vlgmr.msra.gmra.mrb[8].mxu0 %v1255_v27 }
 0x481   : > { %1975 = vmatprep.mubr.msk.bf16.mxu0 %vm2156_vm0, %v2155_v1 }
 0x553   : > { %v1290_v31 = vpop.f32.mrb[8].mxu0 }
 0x554   : > { %1296 = vst.msk [vmem:[#allocation2] sm:$0xff] %vm768_vm1, %v1290_v31  ;;  %v1941_v32 = vpop.f32.mrb[9].mxu0 }
 0x555   : > { %v1293_v33 = vpop.f32.mrb[10].mxu0 }
 0x556   : > { %v1942_v34 = vpop.f32.mrb[11].mxu0 }
 0x55b   : > { %v1297_v35 = vld [vmem:[#allocation2] sm:$0xff] }
 0x55c   : > { %v1298_v36 = vpack.c.bf16 %v1297_v35, %v1297_v35 }
 0x55e   : > { %1948 = vmatmul.mubr.msk.bf16.vlgmr.msra.gmra.mrb[16].mxu1 %vm768_vm1, %v1298_v36 }
 0x55f   : > { %1955 = vmatprep.mubr.msk.bf16.mxu1 %vm2156_vm0, %v2155_v1  ;;  %1952 = vmatpush3.bf16.msra.mxu1 %v2041_v50 }
 0x560   : > { %1953 = vmatprep.subr.bf16.mxu1 %v2155_v1 }
 0x563   : > { %1954 = vmatpush3.bf16.msra.mxu1 %v2042_v51 }
 0x631   : > { %v1359_v38 = vpop.f32.mrb[16].mxu1 }
 0x632   : > { %v1360_v39 = vadd.f32 %v1773_v37, %v1359_v38  ;;  %v1949_v40 = vpop.f32.mrb[17].mxu1 }
 0x633   : > { %v1362_v41 = vpop.f32.mrb[18].mxu1 }
 0x634   : > { %v1950_v42 = vpop.f32.mrb[19].mxu1  ;;  %v1365_v43 = vadd.f32 %v1360_v39, %v2350_v4  ;;  %v2043_v4 = vld [vmem:[%s2804_s12] sm:$0xff]  }
 0x635   : > { %1960 = vmatpush3.bf16.msra.mxu0 %v2043_v4 }
 0x636   : > { %v1368_v44 = vsel %vm768_vm1, %v1365_v43, 0.0  ;;  %1961 = vmatprep.subr.bf16.mxu0 %v2155_v1 }
 0x637   : > { %1369 = vadd.xlane.f32.xlu0 %v1368_v44 }
 0x639   : > { %1962 = vmatpush3.bf16.msra.mxu0 %v2044_v52 }
 0x63a   : > { %1963 = vmatprep.subr.bf16.mxu0 %v2155_v1 }
 0x63d   : > { %1964 = vmatpush3.bf16.msra.mxu0 %v2045_v53 }
 0x63e   : > { %1965 = vmatprep.subr.bf16.mxu0 %v2155_v1 }
 0x641   : > { %1966 = vmatpush3.bf16.msra.mxu0 %v2046_v54 }
 0x642   : > { %1967 = vmatprep.subr.bf16.mxu0 %v2155_v1 }
 0x645   : > { %1968 = vmatpush3.bf16.msra.mxu0 %v2047_v55 }
 0x646   : > { %1969 = vmatprep.subr.bf16.mxu0 %v2155_v1 }
 0x649   : > { %1970 = vmatpush3.bf16.msra.mxu0 %v2048_v56 }
 0x64a   : > { %1971 = vmatprep.subr.bf16.mxu0 %v2155_v1 }
 0x64d   : > { %1972 = vmatpush3.bf16.msra.mxu0 %v2049_v5 }
 0x64e   : > { %1973 = vmatprep.subr.bf16.mxu0 %v2155_v1  ;;  %v1783_v1 = vld [vmem:[%s2805_s13] ss:$0 sm:$0xff] }
 0x651   : > { %1974 = vmatpush3.bf16.msra.mxu0 %v2050_v6 }
 0x6c4   : > { %v1370_v45 = vpop.xlane.xlu0 %1369 }
 0x6c5   : > { %v1372_v46 = vmul.f32 0.03125, %v1370_v45 }
 0x6c7   : > { %v1373_v47 = vsub.f32 %v1365_v43, %v1372_v46 }
 0x6c9   : > { %v1374_v48 = vmul.f32 %v1373_v47, %v1373_v47 }
 0x6cb   : > { %v1375_v49 = vsel %vm768_vm1, %v1374_v48, 0.0 }
 0x6cc   : > { %1376 = vadd.xlane.f32.xlu1 %v1375_v49 }
 0x759   : > { %v1377_v57 = vpop.xlane.xlu1 %1376 }
 0x75a   : > { %v1378_v58 = vmul.f32 0.03125, %v1377_v57 }
 0x75c   : > { %v1379_v59 = vadd.f32 1e-05, %v1378_v58 }
 0x75e   : > { %2055 = vrsqrt.f32 %v1379_v59 }
 0x768   : > { %v2056_v60 = vpop.eup %2055 }
 0x769   : > { %v1381_v62 = vmul.f32 %v2056_v60, %v1373_v47 }
 0x76b   : > { %v1388_v0 = vmul.f32 %v1777_v61, %v1381_v62 }
 0x76d   : > { %v1395_v2 = vadd.f32 %v1778_v63, %v1388_v0 }
 0x76f   : > { %v1396_v3 = vpack.c.bf16 %v1395_v2, %v1395_v2 }
 0x771   : > { %1956 = vmatmul.mubr.msk.bf16.vlgmr.msra.gmra.mrb[20].mxu1 %vm768_vm1, %v1396_v3 }
 0x844   : > { %v1457_v8 = vpop.f32.mrb[20].mxu1 }
 0x845   : > { %v1458_v9 = vadd.f32 %v1779_v7, %v1457_v8  ;;  %v1957_v10 = vpop.f32.mrb[21].mxu1 }
 0x846   : > { %v1460_v11 = vpop.f32.mrb[22].mxu1 }
 0x847   : > { %v1463_v13 = vmax.f32 %v1458_v9, 0.0  ;;  %v1958_v14 = vpop.f32.mrb[23].mxu1 }
 0x849   : > { %v1464_v15 = vpack.c.bf16 %v1463_v13, %v1463_v13 }
 0x84b   : > { %1976 = vmatmul.mubr.bf16.vlgmr.msra.gmra.mrb[12].mxu0 %v1464_v15 }
 0x91e   : > { %v1570_v16 = vpop.f32.mrb[12].mxu0 }
 0x91f   : > { %v1571_v17 = vadd.f32 %v1783_v1, %v1570_v16  ;;  %v1977_v18 = vpop.f32.mrb[13].mxu0 }
 0x920   : > { %v1573_v19 = vpop.f32.mrb[14].mxu0 }
 0x921   : > { %v1978_v12 = vpop.f32.mrb[15].mxu0  ;;  %v1576_v20 = vadd.f32 %v1571_v17, %v1395_v2 }
 0x923   : > { %v1579_v21 = vsel %vm768_vm1, %v1576_v20, 0.0 }
 0x924   : > { %1580 = vadd.xlane.f32.xlu1 %v1579_v21 }
 0x9b1   : > { %v1581_v24 = vpop.xlane.xlu1 %1580 }
 0x9b2   : > { %v1582_v22 = vmul.f32 0.03125, %v1581_v24 }
 0x9b4   : > { %v1583_v23 = vsub.f32 %v1576_v20, %v1582_v22 }
 0x9b6   : > { %v1584_v25 = vmul.f32 %v1583_v23, %v1583_v23 }
 0x9b8   : > { %v1585_v26 = vsel %vm768_vm1, %v1584_v25, 0.0 }
 0x9b9   : > { %1586 = vadd.xlane.f32.xlu0 %v1585_v26 }
 0x9ba   : > { %2072 = shalt.err (!%p2069_p4)
}
 0x9bb   : > { %s2073_s1 = scalar_lea.hbm %s2714_s28, 128  ;;  %s2077_s29 = scalar_lea.hbm %s2815_s23, 256 }
 0x9bc   : > { %p2074_p7 = scmp.ne.s32.totalorder %s2714_s28, %s2073_s1  ;;  %p2078_p10 = scmp.lt.u32.totalorder %s2714_s28, %s2815_s23 }
 0x9bd   : > { %p2079_p11 = scmp.lt.u32.totalorder %s2077_s29, %s2073_s1  ;;  %p2081_p13 = scmp.lt.u32.totalorder %s2073_s1, %s2714_s28 }
 0x9be   : > { %p2075_p8 = pnand %p2074_p7, %p2317_p5 }
 0x9bf   : > { %p2080_p12 = por %p2079_p11, %p2078_p10 }
 0x9c0   : > { %p2076_p9 = pneg %p2075_p8 }
 0x9c1   : > { %p2082_p0 = por %p2081_p13, %p2080_p12 }
 0x9c3   : > { %p2083_p1 = pnand %p2082_p0, %p2076_p9 }
 0x9c5   : > { %2086 = shalt.err (!%p2083_p1)
}
 0x9c6   : > { %1980 = dma.vmem_to_hbm [thread:$0]  (%p2317_p5), %s1640_s6, 128, %s2714_s28, %s1613_s3   ;;  %v1792_v31 = vld [vmem:[%s2808_s16] ss:$0 sm:$0xff] }
 0x9c7   : > { %v1793_v33 = vld [vmem:[%s2809_s17] ss:$0 sm:$0xff]  ;;  %s2859_s0 = sshll.u32 %s2627_s4, 3  ;;  %s2860_s28 = sshll.u32 %s2300_s5, 7 }
 0x9c8   : > { %s721_s26 = scalar_lea.vmem [#allocation3], %s2859_s0  ;;  %s2861_s24 = sld [smem:[#allocation25_spill]] }
 0x9c9   : > { %s1626_s29 = sshll.u32 %s721_s26, 4  ;;  %s1608_s25 = scalar_lea.sflag [#allocation4], %s2627_s4  ;;  %s2750_s29 = int_to_ptr.vmem [resolvable:$true] %s1626_s29 }
 0x9ca   : > { %s2087_s27 = scalar_lea.vmem %s2750_s29, 128  ;;  %s2158_s2 = smov [#allocation3]  }
 0x9cb   : > { %p2088_p2 = scmp.ne.s32.totalorder %s2750_s29, %s2087_s27  ;;  %s2091_s5 = sshll.u32 %s2158_s2, 4  ;;  %s2092_s5 = int_to_ptr.vmem [resolvable:$false] %s2091_s5 }
 0x9cc   : > { %s2093_s1 = scalar_lea.vmem %s2092_s5, 256  ;;  %p2094_p7 = scmp.lt.s32.totalorder %s2750_s29, %s2092_s5 }
 0x9cd   : > { %p2089_p3 = pnand %p2088_p2, %p2317_p5  ;;  %p2095_p8 = scmp.lt.s32.totalorder %s2093_s1, %s2087_s27 }
 0x9ce   : > { %s2862_s8 = smov %s2861_s24  ;;  %s2748_s9 = scalar_lea.hbm %s2861_s24, %s2860_s28 }
 0x9cf   : > { %p2090_p4 = pneg %p2089_p3  ;;  %p2096_p9 = por %p2095_p8, %p2094_p7 }
 0x9d1   : > { %p2097_p10 = pnand %p2096_p9, %p2090_p4 }
 0xa46   : > { %v1587_v27 = vpop.xlane.xlu0 %1586 }
 0xa47   : > { %v1588_v28 = vmul.f32 0.03125, %v1587_v27 }
 0xa49   : > { %v1589_v29 = vadd.f32 1e-05, %v1588_v28 }
 0xa4b   : > { %2057 = vrsqrt.f32 %v1589_v29 }
 0xa55   : > { %v2058_v30 = vpop.eup %2057 }
 0xa56   : > { %v1591_v32 = vmul.f32 %v2058_v30, %v1583_v23 }
 0xa58   : > { %v1598_v34 = vmul.f32 %v1792_v31, %v1591_v32 }
 0xa5a   : > { %v1605_v35 = vadd.f32 %v1793_v33, %v1598_v34 }
 0xa5c   : > { %1606 = vst.msk [vmem:[%s721_s26] sm:$0xff] %vm768_vm1, %v1605_v35 }
 0xa5d   : > { %2100 = shalt.err (!%p2097_p10)
}
 0xa5e   : > { %s2101_s4 = scalar_lea.hbm %s2748_s9, 128  ;;  %s2105_s28 = scalar_lea.hbm %s2862_s8, 256 }
 0xa5f   : > { %p2102_p11 = scmp.ne.s32.totalorder %s2748_s9, %s2101_s4  ;;  %p2106_p0 = scmp.lt.u32.totalorder %s2748_s9, %s2862_s8 }
 0xa60   : > { %p2107_p1 = scmp.lt.u32.totalorder %s2105_s28, %s2101_s4  ;;  %p2109_p3 = scmp.lt.u32.totalorder %s2101_s4, %s2748_s9 }
 0xa61   : > { %p2103_p12 = pnand %p2102_p11, %p2317_p5 }
 0xa62   : > { %p2108_p2 = por %p2107_p1, %p2106_p0 }
 0xa63   : > { %p2104_p13 = pneg %p2103_p12 }
 0xa64   : > { %p2110_p4 = por %p2109_p3, %p2108_p2 }
 0xa66   : > { %p2111_p7 = pnand %p2110_p4, %p2104_p13 }
 0xa68   : > { %2114 = shalt.err (!%p2111_p7)
}
 0xa69   : > { %1979 = dma.vmem_to_hbm [thread:$0]  (%p2317_p5), %s2750_s29, 128, %s2748_s9, %s1608_s25  }
 0xa6a PF: > { %s2863_s24 = sld [smem:[#allocation11_spill]]  ;;  %s2864_s27 = sld [smem:[#allocation9_spill]] }
 0xa70   : > { %p1990_p8 = scmp.ge.s32.totalorder %s2863_s24, 2  ;;  %s1651_s5 = sand.u32 1, %s2864_s27  }
 0xa71   : > { %s1652_s1 = scalar_lea.sflag [#allocation4], %s1651_s5 }
 0xa72   : > { %p1984_p9 = pnand %p1990_p8, %p2321_p6 }
 0xa74   : > { %2132 = dma.done.wait (!%p1984_p9), %s1652_s1, 128  }
 0xa75   : > { %2134 = vsyncadd (!%p1984_p9), %s1652_s1, 4294967168  ;;  %s1661_s4 = scalar_lea.sflag [#allocation6], %s1651_s5 }
 0xa76   : > { %2136 = dma.done.wait (!%p1984_p9), %s1661_s4, 128  }
 0xa77   : > { %2138 = vsyncadd (!%p1984_p9), %s1661_s4, 4294967168  ;;  %s2866_s25 = sld [smem:[#allocation12_spill]]  ;;  %s2867_s7 = sld [smem:[#allocation10_spill]] }
 0xa78   : > { %s2868_s24 = sld [smem:[#allocation13_spill]]  ;;  %s2869_s4 = smov %s2145_s30 }
 0xa7d   : > { %p37_p5 = scmp.ge.s32.totalorder %s2866_s25, 4   ;;  %s2870_s30 = smov %s2867_s7 }
 0xa7f   :  { %39 = sbr.rel (!%p37_p5) target bundleno = 17 (0x11), region = 163 }
 0xa86   :  { %1666 = vsyncpa [#allocation4], 1 }
 0xa87   :  { %1668 = vsyncpa [#allocation4 + $0x1], 1 }
 0xa88   :  { %1669 = vsyncpa [#allocation6], 1 }
 0xa89   :  { %1671 = vsyncpa [#allocation6 + $0x1], 1 }

</bundles_post_ra>
